<compile_context>
chip_gen: v7x
topology: tpu7x:2x2x1
jax: 0.10.0
libtpu: 0.0.40
codegen_flags: <defaults>
</compile_context>

<pallas_src>
import math

import numpy as np
import jax
import jax.numpy as jnp
from jax.experimental import pallas as pl
from jax.experimental.pallas import tpu as pltpu

# ----------------------------- model config ---------------------------------
B, T      = 2, 8          # batch, sequence length (<= max_len=28)
INPUT_D   = 6             # input feature dim
INPUT_PAD = 8             # zero-padded contraction dim for the input projection
D_MODEL   = 32            # embedding dim
N_HEAD    = 2
D_HEAD    = D_MODEL // N_HEAD
N_LAYERS  = 2
D_INNER   = 64
LN_EPS    = 1e-5          # PyTorch LayerNorm default

D3 = 3 * D_MODEL
BT = B * T
BH = B * N_HEAD

SLAB_COLS = 128                         # lane-dense slab width

# ----------------------- bf16 weight-slab layout ------------------------------
# All row offsets are multiples of 16 (bf16 packs 2 rows / sublane).
W_WIN        = 0                        # w_in^T rows [0:INPUT_PAD), cols [0:D)
W_HEADER     = 16
WL_QKV       = 0                        # (D, 3D)   q-columns pre-scaled
WL_WO        = D_MODEL                  # (D, D)
WL_W1        = 2 * D_MODEL              # (D, D_INNER)
WL_W2        = 3 * D_MODEL              # (D_INNER, D)
W_LAYER_ROWS = 3 * D_MODEL + D_INNER    # 160
W_TOTAL_ROWS = W_HEADER + N_LAYERS * W_LAYER_ROWS   # 336

# ------------------------ f32 vector-slab layout ------------------------------
V_GLOB       = 0                        # +0 b_in, +1 gamma_final, +2 beta_final
V_PE         = 8                        # B*T rows of batch-tiled positional enc.
V_HEADER     = V_PE + BT                # 24
V_LAYER_ROWS = 8                        # bqkv, bo, g1, be1, b1, b2, g2, be2
V_TOTAL_ROWS = V_HEADER + N_LAYERS * V_LAYER_ROWS   # 40


def _layernorm(x, g, b, eps=LN_EPS):
    mu = jnp.mean(x, axis=-1, keepdims=True)
    xc = x - mu
    var = jnp.mean(xc * xc, axis=-1, keepdims=True)
    return xc * jax.lax.rsqrt(var + eps) * g + b


# ------------------------------- kernel --------------------------------------
def pe_transformer_kernel(x_ref, pw_ref, pv_ref, out_ref):
    D, DI = D_MODEL, D_INNER
    f32, bf16 = jnp.float32, jnp.bfloat16

    gvec = pv_ref[V_GLOB:V_GLOB + 8, :]                       # (8, 128) f32
    b_in = gvec[0:1, 0:D]
    g_f  = gvec[1:2, 0:D]
    b_f  = gvec[2:3, 0:D]

    # --- input projection + positional encoding (dropout = identity in eval) ---
    x = x_ref[...].astype(bf16)                               # (BT, INPUT_PAD)
    w_in = pw_ref[W_WIN:W_WIN + INPUT_PAD, 0:D]               # (INPUT_PAD, D) bf16
    h = jnp.dot(x, w_in, preferred_element_type=f32) + b_in   # (BT, D) f32
    h = h + pv_ref[V_PE:V_PE + BT, 0:D]                       # + pe (batch-tiled)

    for l in range(N_LAYERS):
        wb = W_HEADER + l * W_LAYER_ROWS
        vb = V_HEADER + l * V_LAYER_ROWS
        wqkv = pw_ref[wb + WL_QKV: wb + WL_QKV + D, 0:D3]     # (D, 3D) bf16
        wo   = pw_ref[wb + WL_WO:  wb + WL_WO + D,  0:D]      # (D, D)  bf16
        w1   = pw_ref[wb + WL_W1:  wb + WL_W1 + D,  0:DI]     # (D, DI) bf16
        w2   = pw_ref[wb + WL_W2:  wb + WL_W2 + DI, 0:D]      # (DI, D) bf16
        lvec = pv_ref[vb:vb + 8, :]                           # (8, 128) f32
        bqkv = lvec[0:1, 0:D3]
        bo   = lvec[1:2, 0:D]
        g1   = lvec[2:3, 0:D]
        be1  = lvec[3:4, 0:D]
        b1   = lvec[4:5, 0:DI]
        b2   = lvec[5:6, 0:D]
        g2   = lvec[6:7, 0:D]
        be2  = lvec[7:8, 0:D]

        # --- multi-head self-attention (q already scaled by 1/sqrt(D_HEAD)) ---
        qkv = jnp.dot(h.astype(bf16), wqkv,
                      preferred_element_type=f32) + bqkv      # (BT, 3D) f32

        def to_heads(m):      # (BT, D) -> (N_HEAD*B, T, D_HEAD), head-major batch
            return jnp.concatenate(
                [m[:, hd * D_HEAD:(hd + 1) * D_HEAD].reshape(B, T, D_HEAD)
                 for hd in range(N_HEAD)], axis=0)

        qh = to_heads(qkv[:, 0:D]).astype(bf16)               # (BH, T, Dh)
        kh = to_heads(qkv[:, D:2 * D]).astype(bf16)
        vh = to_heads(qkv[:, 2 * D:3 * D]).astype(bf16)

        # one batched score matmul + one fused softmax + one batched ctx matmul
        s = jnp.einsum('bqd,bkd->bqk', qh, kh,
                       preferred_element_type=f32)            # (BH, T, T) f32
        s = s - jnp.max(s, axis=-1, keepdims=True)
        e = jnp.exp(s)
        prob = e * pl.reciprocal(jnp.sum(e, axis=-1, keepdims=True), approx=True)
        ctx = jnp.einsum('bqk,bkd->bqd', prob.astype(bf16), vh,
                         preferred_element_type=f32)          # (BH, T, Dh) f32

        # lane-concat heads back to (BT, D); single fused output projection
        ctx_full = jnp.concatenate(
            [ctx[hd * B:(hd + 1) * B].reshape(BT, D_HEAD) for hd in range(N_HEAD)],
            axis=-1)                                          # (BT, D) f32
        attn = jnp.dot(ctx_full.astype(bf16), wo,
                       preferred_element_type=f32) + bo       # (BT, D) f32

        h = _layernorm(h + attn, g1, be1)                     # post-norm 1

        # --- feed-forward ---
        ff = jnp.maximum(jnp.dot(h.astype(bf16), w1,
                                 preferred_element_type=f32) + b1, 0.0)
        ff = jnp.dot(ff.astype(bf16), w2, preferred_element_type=f32) + b2
        h = _layernorm(h + ff, g2, be2)                       # post-norm 2

    # final encoder norm, max over sequence, ReLU
    h = _layernorm(h, g_f, b_f)
    pooled = jnp.max(h.reshape(B, T, D), axis=1)              # (B, D)
    out_ref[...] = jnp.maximum(pooled, 0.0)


# ------------------------------ wrapper ---------------------------------------
@jax.jit
def pe_transformer_forward(x, w_slab, v_slab):
    x2 = x.reshape(BT, INPUT_D)
    x2 = jnp.pad(x2, ((0, 0), (0, INPUT_PAD - INPUT_D)))      # zero-pad K to 8
    vmem = pl.BlockSpec(memory_space=pltpu.MemorySpace.VMEM)
    return pl.pallas_call(
        pe_transformer_kernel,
        out_shape=jax.ShapeDtypeStruct((B, D_MODEL), jnp.float32),
        in_specs=[vmem, vmem, vmem],
        out_specs=vmem,
    )(x2, w_slab, v_slab)


# ---------------------- host-side parameter packing ---------------------------
def pack_params(p):
    wslab = np.zeros((W_TOTAL_ROWS, SLAB_COLS), np.float32)
    vslab = np.zeros((V_TOTAL_ROWS, SLAB_COLS), np.float32)
    scale = 1.0 / math.sqrt(D_HEAD)

    wslab[W_WIN:W_WIN + INPUT_D, 0:D_MODEL] = np.asarray(p['w_in']).T
    vslab[V_GLOB + 0, 0:D_MODEL] = np.asarray(p['b_in'])
    vslab[V_GLOB + 1, 0:D_MODEL] = np.asarray(p['gf'])
    vslab[V_GLOB + 2, 0:D_MODEL] = np.asarray(p['bf'])
    vslab[V_PE:V_PE + BT, 0:D_MODEL] = np.tile(np.asarray(p['pe']), (B, 1))

    for l in range(N_LAYERS):
        wb = W_HEADER + l * W_LAYER_ROWS
        vb = V_HEADER + l * V_LAYER_ROWS
        wqkv_t = np.asarray(p['wqkv'][l]).T.copy()            # (D, 3D)
        wqkv_t[:, 0:D_MODEL] *= scale                         # fold q scale
        wslab[wb + WL_QKV: wb + WL_QKV + D_MODEL, 0:D3] = wqkv_t
        wslab[wb + WL_WO: wb + WL_WO + D_MODEL, 0:D_MODEL] = np.asarray(p['wo'][l]).T
        wslab[wb + WL_W1: wb + WL_W1 + D_MODEL, 0:D_INNER] = np.asarray(p['w1'][l]).T
        wslab[wb + WL_W2: wb + WL_W2 + D_INNER, 0:D_MODEL] = np.asarray(p['w2'][l]).T
        bqkv = np.asarray(p['bqkv'][l]).copy()
        bqkv[0:D_MODEL] *= scale                              # fold q scale
        vslab[vb + 0, 0:D3] = bqkv
        vslab[vb + 1, 0:D_MODEL] = np.asarray(p['bo'][l])
        vslab[vb + 2, 0:D_MODEL] = np.asarray(p['g1'][l])
        vslab[vb + 3, 0:D_MODEL] = np.asarray(p['be1'][l])
        vslab[vb + 4, 0:D_INNER] = np.asarray(p['b1'][l])
        vslab[vb + 5, 0:D_MODEL] = np.asarray(p['b2'][l])
        vslab[vb + 6, 0:D_MODEL] = np.asarray(p['g2'][l])
        vslab[vb + 7, 0:D_MODEL] = np.asarray(p['be2'][l])
    return jnp.asarray(wslab, dtype=jnp.bfloat16), jnp.asarray(vslab)


# ----------------- independent pure-JAX reference (PyTorch math) --------------
def reference_forward(x, p):
    scale = 1.0 / math.sqrt(D_HEAD)
    h = jnp.einsum('bti,oi->bto', x, p['w_in']) + p['b_in']
    h = h + p['pe'][None]
    for l in range(N_LAYERS):
        qkv = jnp.einsum('btd,ed->bte', h, p['wqkv'][l]) + p['bqkv'][l]
        q = qkv[..., :D_MODEL]
        k = qkv[..., D_MODEL:2 * D_MODEL]
        v = qkv[..., 2 * D_MODEL:]
        qh = q.reshape(B, T, N_HEAD, D_HEAD).transpose(0, 2, 1, 3) * scale
        kh = k.reshape(B, T, N_HEAD, D_HEAD).transpose(0, 2, 1, 3)
        vh = v.reshape(B, T, N_HEAD, D_HEAD).transpose(0, 2, 1, 3)
        s = jnp.einsum('bhqd,bhkd->bhqk', qh, kh)
        a = jax.nn.softmax(s, axis=-1)
        ctx = jnp.einsum('bhqk,bhkd->bhqd', a, vh)
        ctx = ctx.transpose(0, 2, 1, 3).reshape(B, T, D_MODEL)
        attn = jnp.einsum('btd,ed->bte', ctx, p['wo'][l]) + p['bo'][l]
        h = _layernorm(h + attn, p['g1'][l], p['be1'][l])
        ff = jax.nn.relu(jnp.einsum('btd,fd->btf', h, p['w1'][l]) + p['b1'][l])
        ff = jnp.einsum('btf,df->btd', ff, p['w2'][l]) + p['b2'][l]
        h = _layernorm(h + ff, p['g2'][l], p['be2'][l])
    h = _layernorm(h, p['gf'], p['bf'])
    return jax.nn.relu(jnp.max(h, axis=1))


# ------------------------- deterministic params --------------------------------
def make_params(key):
    ks = jax.random.split(key, 16)

    def nrm(k, shape, scale=0.1):
        return (scale * jax.random.normal(k, shape)).astype(jnp.float32)

    # sinusoidal positional encoding, pe[t, 2i] = sin, pe[t, 2i+1] = cos
    pos = jnp.arange(T, dtype=jnp.float32)[:, None]
    div = jnp.exp(jnp.arange(0, D_MODEL, 2, dtype=jnp.float32)
                  * (-math.log(10000.0) / D_MODEL))
    pe = jnp.zeros((T, D_MODEL), jnp.float32)
    pe = pe.at[:, 0::2].set(jnp.sin(pos * div))
    pe = pe.at[:, 1::2].set(jnp.cos(pos * div))

    return {
        'pe':   pe,
        'w_in': nrm(ks[0], (D_MODEL, INPUT_D)),          # PyTorch Linear (out, in)
        'b_in': nrm(ks[1], (D_MODEL,)),
        'wqkv': nrm(ks[2],  (N_LAYERS, D3, D_MODEL)),
        'bqkv': nrm(ks[3],  (N_LAYERS, D3)),
        'wo':   nrm(ks[4],  (N_LAYERS, D_MODEL, D_MODEL)),
        'bo':   nrm(ks[5],  (N_LAYERS, D_MODEL)),
        'g1':   1.0 + nrm(ks[6],  (N_LAYERS, D_MODEL), 0.05),
        'be1':  nrm(ks[7],  (N_LAYERS, D_MODEL), 0.05),
        'w1':   nrm(ks[8],  (N_LAYERS, D_INNER, D_MODEL)),
        'b1':   nrm(ks[9],  (N_LAYERS, D_INNER)),
        'w2':   nrm(ks[10], (N_LAYERS, D_MODEL, D_INNER)),
        'b2':   nrm(ks[11], (N_LAYERS, D_MODEL)),
        'g2':   1.0 + nrm(ks[12], (N_LAYERS, D_MODEL), 0.05),
        'be2':  nrm(ks[13], (N_LAYERS, D_MODEL), 0.05),
        'gf':   1.0 + nrm(ks[14], (D_MODEL,), 0.05),
        'bf':   nrm(ks[15], (D_MODEL,), 0.05),
    }


if __name__ == "__main__":
    key = jax.random.PRNGKey(0)
    kx, kp = jax.random.split(key)
    x = jax.random.normal(kx, (B, T, INPUT_D), dtype=jnp.float32)
    params = make_params(kp)
    w_slab, v_slab = pack_params(params)

    out = jax.block_until_ready(pe_transformer_forward(x, w_slab, v_slab))
    ref = jax.block_until_ready(reference_forward(x, params))

    assert out.shape == (B, D_MODEL), out.shape
    assert bool(jnp.all(jnp.isfinite(out)))
    # bf16 MXU operands with f32 accumulation: error stays well inside 2e-2.
    assert jnp.allclose(out, ref, atol=2e-2, rtol=2e-2), \
        f"max abs diff {float(jnp.max(jnp.abs(out - ref)))}"

    print("KERNEL_OK")
</pallas_src>

<mosaic_0001>
module attributes {stable_mosaic.version = 11 : i64} {
  func.func @pe_transformer_kernel(%arg0: memref<16x8xf32, #tpu.memory_space<vmem>>, %arg1: memref<336x128xbf16, #tpu.memory_space<vmem>>, %arg2: memref<40x128xf32, #tpu.memory_space<vmem>>, %arg3: memref<2x32xf32, #tpu.memory_space<vmem>>) attributes {dimension_semantics = [], scalar_prefetch = 0 : i64, scratch_operands = 0 : i64, tpu.core_type = #tpu.core_type<tc>} {
    %c0 = arith.constant 0 : index
    %c0_0 = arith.constant 0 : index
    %0 = vector.load %arg2[%c0, %c0_0] : memref<40x128xf32, #tpu.memory_space<vmem>>, vector<8x128xf32>
    %1 = vector.extract_strided_slice %0 {offsets = [0, 0], sizes = [1, 32], strides = [1, 1]} : vector<8x128xf32> to vector<1x32xf32>
    %2 = vector.extract_strided_slice %0 {offsets = [1, 0], sizes = [1, 32], strides = [1, 1]} : vector<8x128xf32> to vector<1x32xf32>
    %3 = vector.extract_strided_slice %0 {offsets = [2, 0], sizes = [1, 32], strides = [1, 1]} : vector<8x128xf32> to vector<1x32xf32>
    %c0_1 = arith.constant 0 : index
    %c0_2 = arith.constant 0 : index
    %4 = vector.load %arg0[%c0_1, %c0_2] : memref<16x8xf32, #tpu.memory_space<vmem>>, vector<16x8xf32>
    %5 = arith.truncf %4 : vector<16x8xf32> to vector<16x8xbf16>
    %c0_3 = arith.constant 0 : index
    %c0_4 = arith.constant 0 : index
    %6 = vector.load %arg1[%c0_3, %c0_4] : memref<336x128xbf16, #tpu.memory_space<vmem>>, vector<8x32xbf16>
    %cst = arith.constant dense<0.000000e+00> : vector<16x32xf32>
    %7 = tpu.matmul %5, %6, %cst {dimension_numbers = #tpu.dot_dimension_numbers<[1], [0], [0], [1], [0, 0, 1, 1], [], []>} : vector<16x8xbf16>, vector<8x32xbf16>, vector<16x32xf32> -> vector<16x32xf32>
    %8 = vector.broadcast %1 : vector<1x32xf32> to vector<16x32xf32>
    %9 = arith.addf %7, %8 : vector<16x32xf32>
    %c8 = arith.constant 8 : index
    %c0_5 = arith.constant 0 : index
    %10 = vector.load %arg2[%c8, %c0_5] : memref<40x128xf32, #tpu.memory_space<vmem>>, vector<16x32xf32>
    %11 = arith.addf %9, %10 : vector<16x32xf32>
    %c16 = arith.constant 16 : index
    %c0_6 = arith.constant 0 : index
    %12 = vector.load %arg1[%c16, %c0_6] : memref<336x128xbf16, #tpu.memory_space<vmem>>, vector<32x96xbf16>
    %c48 = arith.constant 48 : index
    %c0_7 = arith.constant 0 : index
    %13 = vector.load %arg1[%c48, %c0_7] : memref<336x128xbf16, #tpu.memory_space<vmem>>, vector<32x32xbf16>
    %c80 = arith.constant 80 : index
    %c0_8 = arith.constant 0 : index
    %14 = vector.load %arg1[%c80, %c0_8] : memref<336x128xbf16, #tpu.memory_space<vmem>>, vector<32x64xbf16>
    %c112 = arith.constant 112 : index
    %c0_9 = arith.constant 0 : index
    %15 = vector.load %arg1[%c112, %c0_9] : memref<336x128xbf16, #tpu.memory_space<vmem>>, vector<64x32xbf16>
    %c24 = arith.constant 24 : index
    %c0_10 = arith.constant 0 : index
    %16 = vector.load %arg2[%c24, %c0_10] : memref<40x128xf32, #tpu.memory_space<vmem>>, vector<8x128xf32>
    %17 = vector.extract_strided_slice %16 {offsets = [0, 0], sizes = [1, 96], strides = [1, 1]} : vector<8x128xf32> to vector<1x96xf32>
    %18 = vector.extract_strided_slice %16 {offsets = [1, 0], sizes = [1, 32], strides = [1, 1]} : vector<8x128xf32> to vector<1x32xf32>
    %19 = vector.extract_strided_slice %16 {offsets = [2, 0], sizes = [1, 32], strides = [1, 1]} : vector<8x128xf32> to vector<1x32xf32>
    %20 = vector.extract_strided_slice %16 {offsets = [3, 0], sizes = [1, 32], strides = [1, 1]} : vector<8x128xf32> to vector<1x32xf32>
    %21 = vector.extract_strided_slice %16 {offsets = [4, 0], sizes = [1, 64], strides = [1, 1]} : vector<8x128xf32> to vector<1x64xf32>
    %22 = vector.extract_strided_slice %16 {offsets = [5, 0], sizes = [1, 32], strides = [1, 1]} : vector<8x128xf32> to vector<1x32xf32>
    %23 = vector.extract_strided_slice %16 {offsets = [6, 0], sizes = [1, 32], strides = [1, 1]} : vector<8x128xf32> to vector<1x32xf32>
    %24 = vector.extract_strided_slice %16 {offsets = [7, 0], sizes = [1, 32], strides = [1, 1]} : vector<8x128xf32> to vector<1x32xf32>
    %25 = arith.truncf %11 : vector<16x32xf32> to vector<16x32xbf16>
    %cst_11 = arith.constant dense<0.000000e+00> : vector<16x96xf32>
    %26 = tpu.matmul %25, %12, %cst_11 {dimension_numbers = #tpu.dot_dimension_numbers<[1], [0], [0], [1], [0, 0, 1, 1], [], []>} : vector<16x32xbf16>, vector<32x96xbf16>, vector<16x96xf32> -> vector<16x96xf32>
    %27 = vector.broadcast %17 : vector<1x96xf32> to vector<16x96xf32>
    %28 = arith.addf %26, %27 : vector<16x96xf32>
    %29 = vector.extract_strided_slice %28 {offsets = [0, 0], sizes = [16, 32], strides = [1, 1]} : vector<16x96xf32> to vector<16x32xf32>
    %30 = vector.extract_strided_slice %29 {offsets = [0, 0], sizes = [16, 16], strides = [1, 1]} : vector<16x32xf32> to vector<16x16xf32>
    %31 = vector.shape_cast %30 : vector<16x16xf32> to vector<2x8x16xf32>
    %32 = vector.extract_strided_slice %29 {offsets = [0, 16], sizes = [16, 16], strides = [1, 1]} : vector<16x32xf32> to vector<16x16xf32>
    %33 = vector.shape_cast %32 : vector<16x16xf32> to vector<2x8x16xf32>
    %34 = tpu.concatenate %31, %33 in 0 : vector<2x8x16xf32>, vector<2x8x16xf32> -> vector<4x8x16xf32>
    %35 = arith.truncf %34 : vector<4x8x16xf32> to vector<4x8x16xbf16>
    %36 = vector.extract_strided_slice %28 {offsets = [0, 32], sizes = [16, 32], strides = [1, 1]} : vector<16x96xf32> to vector<16x32xf32>
    %37 = vector.extract_strided_slice %36 {offsets = [0, 0], sizes = [16, 16], strides = [1, 1]} : vector<16x32xf32> to vector<16x16xf32>
    %38 = vector.shape_cast %37 : vector<16x16xf32> to vector<2x8x16xf32>
    %39 = vector.extract_strided_slice %36 {offsets = [0, 16], sizes = [16, 16], strides = [1, 1]} : vector<16x32xf32> to vector<16x16xf32>
    %40 = vector.shape_cast %39 : vector<16x16xf32> to vector<2x8x16xf32>
    %41 = tpu.concatenate %38, %40 in 0 : vector<2x8x16xf32>, vector<2x8x16xf32> -> vector<4x8x16xf32>
    %42 = arith.truncf %41 : vector<4x8x16xf32> to vector<4x8x16xbf16>
    %43 = vector.extract_strided_slice %28 {offsets = [0, 64], sizes = [16, 32], strides = [1, 1]} : vector<16x96xf32> to vector<16x32xf32>
    %44 = vector.extract_strided_slice %43 {offsets = [0, 0], sizes = [16, 16], strides = [1, 1]} : vector<16x32xf32> to vector<16x16xf32>
    %45 = vector.shape_cast %44 : vector<16x16xf32> to vector<2x8x16xf32>
    %46 = vector.extract_strided_slice %43 {offsets = [0, 16], sizes = [16, 16], strides = [1, 1]} : vector<16x32xf32> to vector<16x16xf32>
    %47 = vector.shape_cast %46 : vector<16x16xf32> to vector<2x8x16xf32>
    %48 = tpu.concatenate %45, %47 in 0 : vector<2x8x16xf32>, vector<2x8x16xf32> -> vector<4x8x16xf32>
    %49 = arith.truncf %48 : vector<4x8x16xf32> to vector<4x8x16xbf16>
    "tpu.trace_start"() <{level = 10 : i32, message = "bqd,bkd->bqk"}> : () -> ()
    %cst_12 = arith.constant dense<0.000000e+00> : vector<4x8x8xf32>
    %50 = tpu.matmul %35, %42, %cst_12 {dimension_numbers = #tpu.dot_dimension_numbers<[2], [2], [1], [1], [0, 0, 0, 1, 1, 1], [0], [0]>} : vector<4x8x16xbf16>, vector<4x8x16xbf16>, vector<4x8x8xf32> -> vector<4x8x8xf32>
    "tpu.trace_stop"() : () -> ()
    %cst_13 = arith.constant dense<0xFF800000> : vector<4x8xf32>
    %51 = vector.multi_reduction <maximumf>, %50, %cst_13 [2] : vector<4x8x8xf32> to vector<4x8xf32>
    %52 = vector.shape_cast %51 : vector<4x8xf32> to vector<4x8x1xf32>
    %53 = vector.broadcast %52 : vector<4x8x1xf32> to vector<4x8x8xf32>
    %54 = arith.subf %50, %53 : vector<4x8x8xf32>
    %55 = math.exp %54 : vector<4x8x8xf32>
    %cst_14 = arith.constant dense<0.000000e+00> : vector<4x8xf32>
    %56 = vector.multi_reduction <add>, %55, %cst_14 [2] : vector<4x8x8xf32> to vector<4x8xf32>
    %57 = vector.shape_cast %56 : vector<4x8xf32> to vector<4x8x1xf32>
    %58 = tpu.reciprocal %57 {approx = true} : vector<4x8x1xf32> -> vector<4x8x1xf32>
    %59 = vector.broadcast %58 : vector<4x8x1xf32> to vector<4x8x8xf32>
    %60 = arith.mulf %55, %59 : vector<4x8x8xf32>
    %61 = arith.truncf %60 : vector<4x8x8xf32> to vector<4x8x8xbf16>
    "tpu.trace_start"() <{level = 10 : i32, message = "bqk,bkd->bqd"}> : () -> ()
    %cst_15 = arith.constant dense<0.000000e+00> : vector<4x8x16xf32>
    %62 = tpu.matmul %61, %49, %cst_15 {dimension_numbers = #tpu.dot_dimension_numbers<[2], [1], [1], [2], [0, 0, 0, 1, 1, 2], [0], [0]>} : vector<4x8x8xbf16>, vector<4x8x16xbf16>, vector<4x8x16xf32> -> vector<4x8x16xf32>
    "tpu.trace_stop"() : () -> ()
    %63 = vector.extract_strided_slice %62 {offsets = [0, 0, 0], sizes = [2, 8, 16], strides = [1, 1, 1]} : vector<4x8x16xf32> to vector<2x8x16xf32>
    %64 = vector.shape_cast %63 : vector<2x8x16xf32> to vector<16x16xf32>
    %65 = vector.extract_strided_slice %62 {offsets = [2, 0, 0], sizes = [2, 8, 16], strides = [1, 1, 1]} : vector<4x8x16xf32> to vector<2x8x16xf32>
    %66 = vector.shape_cast %65 : vector<2x8x16xf32> to vector<16x16xf32>
    %67 = tpu.concatenate %64, %66 in 1 : vector<16x16xf32>, vector<16x16xf32> -> vector<16x32xf32>
    %68 = arith.truncf %67 : vector<16x32xf32> to vector<16x32xbf16>
    %cst_16 = arith.constant dense<0.000000e+00> : vector<16x32xf32>
    %69 = tpu.matmul %68, %13, %cst_16 {dimension_numbers = #tpu.dot_dimension_numbers<[1], [0], [0], [1], [0, 0, 1, 1], [], []>} : vector<16x32xbf16>, vector<32x32xbf16>, vector<16x32xf32> -> vector<16x32xf32>
    %70 = vector.broadcast %18 : vector<1x32xf32> to vector<16x32xf32>
    %71 = arith.addf %69, %70 : vector<16x32xf32>
    %72 = arith.addf %11, %71 : vector<16x32xf32>
    %cst_17 = arith.constant dense<0.000000e+00> : vector<16xf32>
    %73 = vector.multi_reduction <add>, %72, %cst_17 [1] : vector<16x32xf32> to vector<16xf32>
    %74 = vector.shape_cast %73 : vector<16xf32> to vector<16x1xf32>
    %cst_18 = arith.constant 3.200000e+01 : f32
    %75 = vector.broadcast %cst_18 : f32 to vector<16x1xf32>
    %76 = arith.divf %74, %75 : vector<16x1xf32>
    %77 = vector.broadcast %76 : vector<16x1xf32> to vector<16x32xf32>
    %78 = arith.subf %72, %77 : vector<16x32xf32>
    %79 = arith.mulf %78, %78 : vector<16x32xf32>
    %cst_19 = arith.constant dense<0.000000e+00> : vector<16xf32>
    %80 = vector.multi_reduction <add>, %79, %cst_19 [1] : vector<16x32xf32> to vector<16xf32>
    %81 = vector.shape_cast %80 : vector<16xf32> to vector<16x1xf32>
    %cst_20 = arith.constant 3.200000e+01 : f32
    %82 = vector.broadcast %cst_20 : f32 to vector<16x1xf32>
    %83 = arith.divf %81, %82 : vector<16x1xf32>
    %cst_21 = arith.constant 9.99999974E-6 : f32
    %84 = vector.broadcast %cst_21 : f32 to vector<16x1xf32>
    %85 = arith.addf %83, %84 : vector<16x1xf32>
    %86 = math.rsqrt %85 : vector<16x1xf32>
    %87 = vector.broadcast %86 : vector<16x1xf32> to vector<16x32xf32>
    %88 = arith.mulf %78, %87 : vector<16x32xf32>
    %89 = vector.broadcast %19 : vector<1x32xf32> to vector<16x32xf32>
    %90 = arith.mulf %88, %89 : vector<16x32xf32>
    %91 = vector.broadcast %20 : vector<1x32xf32> to vector<16x32xf32>
    %92 = arith.addf %90, %91 : vector<16x32xf32>
    %93 = arith.truncf %92 : vector<16x32xf32> to vector<16x32xbf16>
    %cst_22 = arith.constant dense<0.000000e+00> : vector<16x64xf32>
    %94 = tpu.matmul %93, %14, %cst_22 {dimension_numbers = #tpu.dot_dimension_numbers<[1], [0], [0], [1], [0, 0, 1, 1], [], []>} : vector<16x32xbf16>, vector<32x64xbf16>, vector<16x64xf32> -> vector<16x64xf32>
    %95 = vector.broadcast %21 : vector<1x64xf32> to vector<16x64xf32>
    %96 = arith.addf %94, %95 : vector<16x64xf32>
    %cst_23 = arith.constant 0.000000e+00 : f32
    %97 = vector.broadcast %cst_23 : f32 to vector<16x64xf32>
    %98 = arith.maximumf %96, %97 : vector<16x64xf32>
    %99 = arith.truncf %98 : vector<16x64xf32> to vector<16x64xbf16>
    %cst_24 = arith.constant dense<0.000000e+00> : vector<16x32xf32>
    %100 = tpu.matmul %99, %15, %cst_24 {dimension_numbers = #tpu.dot_dimension_numbers<[1], [0], [0], [1], [0, 0, 1, 1], [], []>} : vector<16x64xbf16>, vector<64x32xbf16>, vector<16x32xf32> -> vector<16x32xf32>
    %101 = vector.broadcast %22 : vector<1x32xf32> to vector<16x32xf32>
    %102 = arith.addf %100, %101 : vector<16x32xf32>
    %103 = arith.addf %92, %102 : vector<16x32xf32>
    %cst_25 = arith.constant dense<0.000000e+00> : vector<16xf32>
    %104 = vector.multi_reduction <add>, %103, %cst_25 [1] : vector<16x32xf32> to vector<16xf32>
    %105 = vector.shape_cast %104 : vector<16xf32> to vector<16x1xf32>
    %cst_26 = arith.constant 3.200000e+01 : f32
    %106 = vector.broadcast %cst_26 : f32 to vector<16x1xf32>
    %107 = arith.divf %105, %106 : vector<16x1xf32>
    %108 = vector.broadcast %107 : vector<16x1xf32> to vector<16x32xf32>
    %109 = arith.subf %103, %108 : vector<16x32xf32>
    %110 = arith.mulf %109, %109 : vector<16x32xf32>
    %cst_27 = arith.constant dense<0.000000e+00> : vector<16xf32>
    %111 = vector.multi_reduction <add>, %110, %cst_27 [1] : vector<16x32xf32> to vector<16xf32>
    %112 = vector.shape_cast %111 : vector<16xf32> to vector<16x1xf32>
    %cst_28 = arith.constant 3.200000e+01 : f32
    %113 = vector.broadcast %cst_28 : f32 to vector<16x1xf32>
    %114 = arith.divf %112, %113 : vector<16x1xf32>
    %cst_29 = arith.constant 9.99999974E-6 : f32
    %115 = vector.broadcast %cst_29 : f32 to vector<16x1xf32>
    %116 = arith.addf %114, %115 : vector<16x1xf32>
    %117 = math.rsqrt %116 : vector<16x1xf32>
    %118 = vector.broadcast %117 : vector<16x1xf32> to vector<16x32xf32>
    %119 = arith.mulf %109, %118 : vector<16x32xf32>
    %120 = vector.broadcast %23 : vector<1x32xf32> to vector<16x32xf32>
    %121 = arith.mulf %119, %120 : vector<16x32xf32>
    %122 = vector.broadcast %24 : vector<1x32xf32> to vector<16x32xf32>
    %123 = arith.addf %121, %122 : vector<16x32xf32>
    %c176 = arith.constant 176 : index
    %c0_30 = arith.constant 0 : index
    %124 = vector.load %arg1[%c176, %c0_30] : memref<336x128xbf16, #tpu.memory_space<vmem>>, vector<32x96xbf16>
    %c208 = arith.constant 208 : index
    %c0_31 = arith.constant 0 : index
    %125 = vector.load %arg1[%c208, %c0_31] : memref<336x128xbf16, #tpu.memory_space<vmem>>, vector<32x32xbf16>
    %c240 = arith.constant 240 : index
    %c0_32 = arith.constant 0 : index
    %126 = vector.load %arg1[%c240, %c0_32] : memref<336x128xbf16, #tpu.memory_space<vmem>>, vector<32x64xbf16>
    %c272 = arith.constant 272 : index
    %c0_33 = arith.constant 0 : index
    %127 = vector.load %arg1[%c272, %c0_33] : memref<336x128xbf16, #tpu.memory_space<vmem>>, vector<64x32xbf16>
    %c32 = arith.constant 32 : index
    %c0_34 = arith.constant 0 : index
    %128 = vector.load %arg2[%c32, %c0_34] : memref<40x128xf32, #tpu.memory_space<vmem>>, vector<8x128xf32>
    %129 = vector.extract_strided_slice %128 {offsets = [0, 0], sizes = [1, 96], strides = [1, 1]} : vector<8x128xf32> to vector<1x96xf32>
    %130 = vector.extract_strided_slice %128 {offsets = [1, 0], sizes = [1, 32], strides = [1, 1]} : vector<8x128xf32> to vector<1x32xf32>
    %131 = vector.extract_strided_slice %128 {offsets = [2, 0], sizes = [1, 32], strides = [1, 1]} : vector<8x128xf32> to vector<1x32xf32>
    %132 = vector.extract_strided_slice %128 {offsets = [3, 0], sizes = [1, 32], strides = [1, 1]} : vector<8x128xf32> to vector<1x32xf32>
    %133 = vector.extract_strided_slice %128 {offsets = [4, 0], sizes = [1, 64], strides = [1, 1]} : vector<8x128xf32> to vector<1x64xf32>
    %134 = vector.extract_strided_slice %128 {offsets = [5, 0], sizes = [1, 32], strides = [1, 1]} : vector<8x128xf32> to vector<1x32xf32>
    %135 = vector.extract_strided_slice %128 {offsets = [6, 0], sizes = [1, 32], strides = [1, 1]} : vector<8x128xf32> to vector<1x32xf32>
    %136 = vector.extract_strided_slice %128 {offsets = [7, 0], sizes = [1, 32], strides = [1, 1]} : vector<8x128xf32> to vector<1x32xf32>
    %137 = arith.truncf %123 : vector<16x32xf32> to vector<16x32xbf16>
    %cst_35 = arith.constant dense<0.000000e+00> : vector<16x96xf32>
    %138 = tpu.matmul %137, %124, %cst_35 {dimension_numbers = #tpu.dot_dimension_numbers<[1], [0], [0], [1], [0, 0, 1, 1], [], []>} : vector<16x32xbf16>, vector<32x96xbf16>, vector<16x96xf32> -> vector<16x96xf32>
    %139 = vector.broadcast %129 : vector<1x96xf32> to vector<16x96xf32>
    %140 = arith.addf %138, %139 : vector<16x96xf32>
    %141 = vector.extract_strided_slice %140 {offsets = [0, 0], sizes = [16, 32], strides = [1, 1]} : vector<16x96xf32> to vector<16x32xf32>
    %142 = vector.extract_strided_slice %141 {offsets = [0, 0], sizes = [16, 16], strides = [1, 1]} : vector<16x32xf32> to vector<16x16xf32>
    %143 = vector.shape_cast %142 : vector<16x16xf32> to vector<2x8x16xf32>
    %144 = vector.extract_strided_slice %141 {offsets = [0, 16], sizes = [16, 16], strides = [1, 1]} : vector<16x32xf32> to vector<16x16xf32>
    %145 = vector.shape_cast %144 : vector<16x16xf32> to vector<2x8x16xf32>
    %146 = tpu.concatenate %143, %145 in 0 : vector<2x8x16xf32>, vector<2x8x16xf32> -> vector<4x8x16xf32>
    %147 = arith.truncf %146 : vector<4x8x16xf32> to vector<4x8x16xbf16>
    %148 = vector.extract_strided_slice %140 {offsets = [0, 32], sizes = [16, 32], strides = [1, 1]} : vector<16x96xf32> to vector<16x32xf32>
    %149 = vector.extract_strided_slice %148 {offsets = [0, 0], sizes = [16, 16], strides = [1, 1]} : vector<16x32xf32> to vector<16x16xf32>
    %150 = vector.shape_cast %149 : vector<16x16xf32> to vector<2x8x16xf32>
    %151 = vector.extract_strided_slice %148 {offsets = [0, 16], sizes = [16, 16], strides = [1, 1]} : vector<16x32xf32> to vector<16x16xf32>
    %152 = vector.shape_cast %151 : vector<16x16xf32> to vector<2x8x16xf32>
    %153 = tpu.concatenate %150, %152 in 0 : vector<2x8x16xf32>, vector<2x8x16xf32> -> vector<4x8x16xf32>
    %154 = arith.truncf %153 : vector<4x8x16xf32> to vector<4x8x16xbf16>
    %155 = vector.extract_strided_slice %140 {offsets = [0, 64], sizes = [16, 32], strides = [1, 1]} : vector<16x96xf32> to vector<16x32xf32>
    %156 = vector.extract_strided_slice %155 {offsets = [0, 0], sizes = [16, 16], strides = [1, 1]} : vector<16x32xf32> to vector<16x16xf32>
    %157 = vector.shape_cast %156 : vector<16x16xf32> to vector<2x8x16xf32>
    %158 = vector.extract_strided_slice %155 {offsets = [0, 16], sizes = [16, 16], strides = [1, 1]} : vector<16x32xf32> to vector<16x16xf32>
    %159 = vector.shape_cast %158 : vector<16x16xf32> to vector<2x8x16xf32>
    %160 = tpu.concatenate %157, %159 in 0 : vector<2x8x16xf32>, vector<2x8x16xf32> -> vector<4x8x16xf32>
    %161 = arith.truncf %160 : vector<4x8x16xf32> to vector<4x8x16xbf16>
    "tpu.trace_start"() <{level = 10 : i32, message = "bqd,bkd->bqk"}> : () -> ()
    %cst_36 = arith.constant dense<0.000000e+00> : vector<4x8x8xf32>
    %162 = tpu.matmul %147, %154, %cst_36 {dimension_numbers = #tpu.dot_dimension_numbers<[2], [2], [1], [1], [0, 0, 0, 1, 1, 1], [0], [0]>} : vector<4x8x16xbf16>, vector<4x8x16xbf16>, vector<4x8x8xf32> -> vector<4x8x8xf32>
    "tpu.trace_stop"() : () -> ()
    %cst_37 = arith.constant dense<0xFF800000> : vector<4x8xf32>
    %163 = vector.multi_reduction <maximumf>, %162, %cst_37 [2] : vector<4x8x8xf32> to vector<4x8xf32>
    %164 = vector.shape_cast %163 : vector<4x8xf32> to vector<4x8x1xf32>
    %165 = vector.broadcast %164 : vector<4x8x1xf32> to vector<4x8x8xf32>
    %166 = arith.subf %162, %165 : vector<4x8x8xf32>
    %167 = math.exp %166 : vector<4x8x8xf32>
    %cst_38 = arith.constant dense<0.000000e+00> : vector<4x8xf32>
    %168 = vector.multi_reduction <add>, %167, %cst_38 [2] : vector<4x8x8xf32> to vector<4x8xf32>
    %169 = vector.shape_cast %168 : vector<4x8xf32> to vector<4x8x1xf32>
    %170 = tpu.reciprocal %169 {approx = true} : vector<4x8x1xf32> -> vector<4x8x1xf32>
    %171 = vector.broadcast %170 : vector<4x8x1xf32> to vector<4x8x8xf32>
    %172 = arith.mulf %167, %171 : vector<4x8x8xf32>
    %173 = arith.truncf %172 : vector<4x8x8xf32> to vector<4x8x8xbf16>
    "tpu.trace_start"() <{level = 10 : i32, message = "bqk,bkd->bqd"}> : () -> ()
    %cst_39 = arith.constant dense<0.000000e+00> : vector<4x8x16xf32>
    %174 = tpu.matmul %173, %161, %cst_39 {dimension_numbers = #tpu.dot_dimension_numbers<[2], [1], [1], [2], [0, 0, 0, 1, 1, 2], [0], [0]>} : vector<4x8x8xbf16>, vector<4x8x16xbf16>, vector<4x8x16xf32> -> vector<4x8x16xf32>
    "tpu.trace_stop"() : () -> ()
    %175 = vector.extract_strided_slice %174 {offsets = [0, 0, 0], sizes = [2, 8, 16], strides = [1, 1, 1]} : vector<4x8x16xf32> to vector<2x8x16xf32>
    %176 = vector.shape_cast %175 : vector<2x8x16xf32> to vector<16x16xf32>
    %177 = vector.extract_strided_slice %174 {offsets = [2, 0, 0], sizes = [2, 8, 16], strides = [1, 1, 1]} : vector<4x8x16xf32> to vector<2x8x16xf32>
    %178 = vector.shape_cast %177 : vector<2x8x16xf32> to vector<16x16xf32>
    %179 = tpu.concatenate %176, %178 in 1 : vector<16x16xf32>, vector<16x16xf32> -> vector<16x32xf32>
    %180 = arith.truncf %179 : vector<16x32xf32> to vector<16x32xbf16>
    %cst_40 = arith.constant dense<0.000000e+00> : vector<16x32xf32>
    %181 = tpu.matmul %180, %125, %cst_40 {dimension_numbers = #tpu.dot_dimension_numbers<[1], [0], [0], [1], [0, 0, 1, 1], [], []>} : vector<16x32xbf16>, vector<32x32xbf16>, vector<16x32xf32> -> vector<16x32xf32>
    %182 = vector.broadcast %130 : vector<1x32xf32> to vector<16x32xf32>
    %183 = arith.addf %181, %182 : vector<16x32xf32>
    %184 = arith.addf %123, %183 : vector<16x32xf32>
    %cst_41 = arith.constant dense<0.000000e+00> : vector<16xf32>
    %185 = vector.multi_reduction <add>, %184, %cst_41 [1] : vector<16x32xf32> to vector<16xf32>
    %186 = vector.shape_cast %185 : vector<16xf32> to vector<16x1xf32>
    %cst_42 = arith.constant 3.200000e+01 : f32
    %187 = vector.broadcast %cst_42 : f32 to vector<16x1xf32>
    %188 = arith.divf %186, %187 : vector<16x1xf32>
    %189 = vector.broadcast %188 : vector<16x1xf32> to vector<16x32xf32>
    %190 = arith.subf %184, %189 : vector<16x32xf32>
    %191 = arith.mulf %190, %190 : vector<16x32xf32>
    %cst_43 = arith.constant dense<0.000000e+00> : vector<16xf32>
    %192 = vector.multi_reduction <add>, %191, %cst_43 [1] : vector<16x32xf32> to vector<16xf32>
    %193 = vector.shape_cast %192 : vector<16xf32> to vector<16x1xf32>
    %cst_44 = arith.constant 3.200000e+01 : f32
    %194 = vector.broadcast %cst_44 : f32 to vector<16x1xf32>
    %195 = arith.divf %193, %194 : vector<16x1xf32>
    %cst_45 = arith.constant 9.99999974E-6 : f32
    %196 = vector.broadcast %cst_45 : f32 to vector<16x1xf32>
    %197 = arith.addf %195, %196 : vector<16x1xf32>
    %198 = math.rsqrt %197 : vector<16x1xf32>
    %199 = vector.broadcast %198 : vector<16x1xf32> to vector<16x32xf32>
    %200 = arith.mulf %190, %199 : vector<16x32xf32>
    %201 = vector.broadcast %131 : vector<1x32xf32> to vector<16x32xf32>
    %202 = arith.mulf %200, %201 : vector<16x32xf32>
    %203 = vector.broadcast %132 : vector<1x32xf32> to vector<16x32xf32>
    %204 = arith.addf %202, %203 : vector<16x32xf32>
    %205 = arith.truncf %204 : vector<16x32xf32> to vector<16x32xbf16>
    %cst_46 = arith.constant dense<0.000000e+00> : vector<16x64xf32>
    %206 = tpu.matmul %205, %126, %cst_46 {dimension_numbers = #tpu.dot_dimension_numbers<[1], [0], [0], [1], [0, 0, 1, 1], [], []>} : vector<16x32xbf16>, vector<32x64xbf16>, vector<16x64xf32> -> vector<16x64xf32>
    %207 = vector.broadcast %133 : vector<1x64xf32> to vector<16x64xf32>
    %208 = arith.addf %206, %207 : vector<16x64xf32>
    %cst_47 = arith.constant 0.000000e+00 : f32
    %209 = vector.broadcast %cst_47 : f32 to vector<16x64xf32>
    %210 = arith.maximumf %208, %209 : vector<16x64xf32>
    %211 = arith.truncf %210 : vector<16x64xf32> to vector<16x64xbf16>
    %cst_48 = arith.constant dense<0.000000e+00> : vector<16x32xf32>
    %212 = tpu.matmul %211, %127, %cst_48 {dimension_numbers = #tpu.dot_dimension_numbers<[1], [0], [0], [1], [0, 0, 1, 1], [], []>} : vector<16x64xbf16>, vector<64x32xbf16>, vector<16x32xf32> -> vector<16x32xf32>
    %213 = vector.broadcast %134 : vector<1x32xf32> to vector<16x32xf32>
    %214 = arith.addf %212, %213 : vector<16x32xf32>
    %215 = arith.addf %204, %214 : vector<16x32xf32>
    %cst_49 = arith.constant dense<0.000000e+00> : vector<16xf32>
    %216 = vector.multi_reduction <add>, %215, %cst_49 [1] : vector<16x32xf32> to vector<16xf32>
    %217 = vector.shape_cast %216 : vector<16xf32> to vector<16x1xf32>
    %cst_50 = arith.constant 3.200000e+01 : f32
    %218 = vector.broadcast %cst_50 : f32 to vector<16x1xf32>
    %219 = arith.divf %217, %218 : vector<16x1xf32>
    %220 = vector.broadcast %219 : vector<16x1xf32> to vector<16x32xf32>
    %221 = arith.subf %215, %220 : vector<16x32xf32>
    %222 = arith.mulf %221, %221 : vector<16x32xf32>
    %cst_51 = arith.constant dense<0.000000e+00> : vector<16xf32>
    %223 = vector.multi_reduction <add>, %222, %cst_51 [1] : vector<16x32xf32> to vector<16xf32>
    %224 = vector.shape_cast %223 : vector<16xf32> to vector<16x1xf32>
    %cst_52 = arith.constant 3.200000e+01 : f32
    %225 = vector.broadcast %cst_52 : f32 to vector<16x1xf32>
    %226 = arith.divf %224, %225 : vector<16x1xf32>
    %cst_53 = arith.constant 9.99999974E-6 : f32
    %227 = vector.broadcast %cst_53 : f32 to vector<16x1xf32>
    %228 = arith.addf %226, %227 : vector<16x1xf32>
    %229 = math.rsqrt %228 : vector<16x1xf32>
    %230 = vector.broadcast %229 : vector<16x1xf32> to vector<16x32xf32>
    %231 = arith.mulf %221, %230 : vector<16x32xf32>
    %232 = vector.broadcast %135 : vector<1x32xf32> to vector<16x32xf32>
    %233 = arith.mulf %231, %232 : vector<16x32xf32>
    %234 = vector.broadcast %136 : vector<1x32xf32> to vector<16x32xf32>
    %235 = arith.addf %233, %234 : vector<16x32xf32>
    %cst_54 = arith.constant dense<0.000000e+00> : vector<16xf32>
    %236 = vector.multi_reduction <add>, %235, %cst_54 [1] : vector<16x32xf32> to vector<16xf32>
    %237 = vector.shape_cast %236 : vector<16xf32> to vector<16x1xf32>
    %cst_55 = arith.constant 3.200000e+01 : f32
    %238 = vector.broadcast %cst_55 : f32 to vector<16x1xf32>
    %239 = arith.divf %237, %238 : vector<16x1xf32>
    %240 = vector.broadcast %239 : vector<16x1xf32> to vector<16x32xf32>
    %241 = arith.subf %235, %240 : vector<16x32xf32>
    %242 = arith.mulf %241, %241 : vector<16x32xf32>
    %cst_56 = arith.constant dense<0.000000e+00> : vector<16xf32>
    %243 = vector.multi_reduction <add>, %242, %cst_56 [1] : vector<16x32xf32> to vector<16xf32>
    %244 = vector.shape_cast %243 : vector<16xf32> to vector<16x1xf32>
    %cst_57 = arith.constant 3.200000e+01 : f32
    %245 = vector.broadcast %cst_57 : f32 to vector<16x1xf32>
    %246 = arith.divf %244, %245 : vector<16x1xf32>
    %cst_58 = arith.constant 9.99999974E-6 : f32
    %247 = vector.broadcast %cst_58 : f32 to vector<16x1xf32>
    %248 = arith.addf %246, %247 : vector<16x1xf32>
    %249 = math.rsqrt %248 : vector<16x1xf32>
    %250 = vector.broadcast %249 : vector<16x1xf32> to vector<16x32xf32>
    %251 = arith.mulf %241, %250 : vector<16x32xf32>
    %252 = vector.broadcast %2 : vector<1x32xf32> to vector<16x32xf32>
    %253 = arith.mulf %251, %252 : vector<16x32xf32>
    %254 = vector.broadcast %3 : vector<1x32xf32> to vector<16x32xf32>
    %255 = arith.addf %253, %254 : vector<16x32xf32>
    %256 = vector.shape_cast %255 : vector<16x32xf32> to vector<2x8x32xf32>
    %cst_59 = arith.constant dense<0xFF800000> : vector<2x32xf32>
    %257 = vector.multi_reduction <maximumf>, %256, %cst_59 [1] : vector<2x8x32xf32> to vector<2x32xf32>
    %cst_60 = arith.constant 0.000000e+00 : f32
    %258 = vector.broadcast %cst_60 : f32 to vector<2x32xf32>
    %259 = arith.maximumf %257, %258 : vector<2x32xf32>
    %c0_61 = arith.constant 0 : index
    %c0_62 = arith.constant 0 : index
    %260 = vector.load %arg3[%c0_61, %c0_62] : memref<2x32xf32, #tpu.memory_space<vmem>>, vector<2x32xf32>
    tpu.vector_store %arg3[%c0_61, %c0_62], %259 {strides = array<i32>} : memref<2x32xf32, #tpu.memory_space<vmem>>, vector<2x32xf32>,
    return
  }
}

</mosaic_0001>

<bundles_post_ra>
// kernel: pe_transformer_forward.1
= control target key start
LH: loop header
LB: loop body
LE: loop exit
PB: predicated region body
PF: predicated region fallthrough
CT: control target
= control target key end

     0   :  { %8 = vsyncpa [#allocation3], 0  ;;  %s2618_s0 = inlined_call_operand.vmem [shape: f32[16,8], index: 0, kind: input, shape index: {}]   ;;  %s2619_s1 = inlined_call_operand.hbm [shape: bf16[336,128], index: 1, kind: input, shape index: {}]   ;;  %s2620_s2 = inlined_call_operand.vmem [shape: f32[40,128], index: 2, kind: input, shape index: {}]   ;;  %s2621_s3 = inlined_call_operand.hbm [shape: f32[2,32], index: 3, kind: output, shape index: {}]  }
   0x1   :  { %9 = vsyncpa [#allocation4], 0  ;;  %s2237_s12 = smov [#allocation2]   ;;  %s2189_s16 = scalar_lea.hbm %s2619_s1, 2688 }
   0x2   :  { %s17_s13 = sshll.u32 %s2237_s12, 4  ;;  %p2190_p0 = scmp.ne.s32.totalorder %s2619_s1, %s2189_s16  ;;  %s18_s13 = int_to_ptr.vmem [resolvable:$true] %s17_s13 }
   0x3   :  { %p2193_p1 = scmp.lt.u32.totalorder %s2189_s16, %s2619_s1 }
   0x5   :  { %p2195_p2 = pnand %p2193_p1, %p2190_p0 }
   0x7   :  { %2198 = shalt.err (!%p2195_p2)
}
   0x8   :  { %s2199_s21 = scalar_lea.vmem %s18_s13, 2688  ;;  %p2204_p4 = scmp.lt.s32.totalorder %s18_s13, %s18_s13 }
   0x9   :  { %p2200_p3 = scmp.ne.s32.totalorder %s18_s13, %s2199_s21  ;;  %p2205_p5 = scmp.lt.s32.totalorder %s2199_s21, %s2199_s21 }
   0xb   :  { %p2206_p6 = por %p2205_p5, %p2204_p4 }
   0xd   :  { %p2207_p7 = pnand %p2206_p6, %p2200_p3 }
   0xf   :  { %2210 = shalt.err (!%p2207_p7)
}
  0x10   :  { %s2238_s22 = smov 64   ;;  %s2239_s23 = smov 4  }
  0x11   :  { %23 = dma.hbm_to_vmem [thread:$0]  %s2619_s1, 2688, %s18_s13, [#allocation3], %s2238_s22, %s2238_s22, %s2239_s23  }
  0x12   :  { %2233 = dma.done.wait [#allocation3], 2688  }
  0x13   :  { %2234 = vsyncadd [#allocation3], 4294964608  ;;  %v2240_v0 = vmov 0.0   ;;  %vm2241_vm0 = vmmov 0   ;;  %vm43_vm1 = vcmask 1043456   ;;  %v31_v2 = vld [vmem:[%s2618_s0] sm:$0xff]  ;;  %v35_v8 = vlaneseq }
  0x14   :  { %1913 = vmatprep.subr.bf16.mxu0 %v2240_v0  ;;  %1915 = vmatprep.mubr.msk.bf16.mxu0 %vm2241_vm0, %v2240_v0  ;;  %v34_v1 = vld [vmem:[#allocation2] sm:$0xf]  ;;  %vm39_vm2 = vcmask 64512   ;;  %v2116_v6 = vld [vmem:[#allocation2 + $0x8] sm:$0xff]   ;;  %v2117_v7 = vld [vmem:[#allocation2 + $0x10] sm:$0xff]   ;;  %vm130_vm3 = vcmask 261120  }
  0x15   :  { %1933 = vmatprep.subr.bf16.mxu1 %v2240_v0  ;;  %1935 = vmatprep.mubr.msk.bf16.mxu1 %vm2241_vm0, %v2240_v0  ;;  %v32_v3 = vld [vmem:[%s2618_s0 + $0x8] sm:$0xff]  ;;  %v45_v4 = vsel %vm43_vm1, %v34_v1, 0  ;;  %v2299_v9 = vshrl.u32 %v35_v8, 7  ;;  %v30_v11 = vld [vmem:[%s2620_s2] sm:$0xff]  ;;  %v89_v18 = vld [vmem:[%s2620_s2 + $0x10] sm:$0xff]  ;;  %s2242_s9 = smov 112  }
  0x16   :  { %v33_v5 = vpack.c.bf16 %v32_v3, %v31_v2  ;;  %1914 = vmatpush3.bf16.msra.mxu0 %v45_v4  ;;  %v88_v16 = vld [vmem:[%s2620_s2 + $0x8] sm:$0xff]  ;;  %v2326_v24 = vld [vmem:[%s2620_s2 + $0x18] sm:$0xff]  ;;  %s2243_s10 = smov 96   ;;  %vm190_vm4 = vcmask 130048   ;;  %s2244_s11 = smov 16   ;;  %vm828_vm5 = vcmask 523264  }
  0x17   :  { %1919 = vmatprep.subr.bf16.mxu0 %v2240_v0  ;;  %v2302_v10 = vsub.s32 0, %v2299_v9  ;;  %vm1786_vm6 = vcmask 1041409   ;;  %vm1789_vm7 = vcmask 254976  }
  0x19   :  { %1916 = vmatmul.mubr.msk.bf16.vlgmr.msra.gmra.mrb[0].mxu0 %vm39_vm2, %v33_v5  ;;  %v38_v12 = vrot.slane %v30_v11, %v2302_v10  ;;  %v117_v25 = vrot.slane %v2326_v24, %v2302_v10 }
  0x1a   :  { %1923 = vmatprep.mubr.msk.bf16.mxu0 %vm2241_vm0, %v2240_v0  ;;  %1920 = vmatpush3.bf16.msra.mxu0 %v2116_v6 }
  0x1b   :  { %1921 = vmatprep.subr.bf16.mxu0 %v2240_v0 }
  0x1e   :  { %1922 = vmatpush3.bf16.msra.mxu0 %v2117_v7 }
  0x1f   :  { %1927 = vmatprep.subr.bf16.mxu0 %v2240_v0 }
  0xec   :  { %v81_v13 = vpop.f32.mrb[0].mxu0 }
  0xed   :  { %v82_v14 = vadd.f32 %v81_v13, %v38_v12  ;;  %v1917_v15 = vpop.f32.mrb[1].mxu0 }
  0xee   :  { %v84_v17 = vpop.f32.mrb[2].mxu0 }
  0xef   :  { %v85_v19 = vadd.f32 %v84_v17, %v38_v12  ;;  %v1918_v20 = vpop.f32.mrb[3].mxu0  ;;  %v2314_v21 = vadd.f32 %v88_v16, %v82_v14 }
  0xf1   :  { %v2316_v22 = vadd.f32 %v89_v18, %v85_v19 }
  0xf3   :  { %v113_v23 = vpack.c.bf16 %v2316_v22, %v2314_v21 }
  0xf5   :  { %1924 = vmatmul.mubr.msk.bf16.vlgmr.msra.gmra.mrb[4].mxu0 %vm130_vm3, %v113_v23 }
  0xf6   :  { %1929 = vmatprep.mubr.msk.bf16.mxu0 %vm2241_vm0, %v2240_v0 }
 0x1c8   :  { %v168_v26 = vpop.f32.mrb[4].mxu0 }
 0x1c9   :  { %v1925_v27 = vpop.f32.mrb[5].mxu0  ;;  %v169_v29 = vadd.f32 %v168_v26, %v117_v25 }
 0x1ca   :  { %v171_v28 = vpop.f32.mrb[6].mxu0 }
 0x1cb   :  { %v172_v30 = vadd.f32 %v171_v28, %v117_v25  ;;  %v1926_v31 = vpop.f32.mrb[7].mxu0  ;;  %v183_v34 = vpack.c.bf16 %v169_v29, %v169_v29 }
 0x1cd   :  { %v2330_v32 = vpack.c.bf16 %v172_v30, %v172_v30  ;;  %v2096_v33 = vpack.i.bf16 %v172_v30, %v169_v29 }
 0x1cf   :  { %2097 = vrot.lane.b32.xlu0 %v2096_v33, %s2242_s9  ;;  %238 = vrot.lane.b32.xlu1 %v2330_v32, %s2243_s10 }
 0x1d3   :  { %188 = vrot.lane.b32.xlu0 %v183_v34, %s2243_s10 }
 0x241   :  { %v2098_v35 = vpop.permute.xlu0 %2097  ;;  %v239_v36 = vpop.permute.xlu1 %238 }
 0x242   :  { %v2100_v37 = vunpack.i.h.bf16 %v2098_v35  ;;  %v2099_v38 = vunpack.i.l.bf16 %v2098_v35  ;;  %v244_v39 = vsel %vm190_vm4, %v239_v36, 0 }
 0x243   :  { %1934 = vmatpush3.bf16.xpose.msra.mxu1 %v244_v39 }
 0x244   :  { %v2337_v40 = vpack.c.bf16 %v2100_v37, %v2100_v37  ;;  %v2339_v41 = vpack.c.bf16 %v2099_v38, %v2099_v38  ;;  %1945 = vmatprep.subr.bf16.mxu1 %v2240_v0 }
 0x245   :  { %v189_v42 = vpop.permute.xlu0 %188 }
 0x246   :  { %v195_v43 = vsel %vm190_vm4, %v189_v42, 0  ;;  %336 = vrot.lane.b32.xlu0 %v2337_v40, %s2243_s10  ;;  %287 = vrot.lane.b32.xlu1 %v2339_v41, %s2243_s10 }
 0x247   :  { %1928 = vmatpush3.bf16.xpose.msra.mxu0 %v195_v43 }
 0x248   :  { %1939 = vmatprep.subr.bf16.mxu0 %v2240_v0 }
 0x24a   :  { %1936 = vmatmul.mubr.msk.bf16.vlgmr.msra.gmra.mrb[0].mxu1 %vm190_vm4, %v2330_v32 }
 0x24b   :  { %1947 = vmatprep.mubr.msk.bf16.mxu1 %vm2241_vm0, %v2240_v0 }
 0x24e   :  { %1930 = vmatmul.mubr.msk.bf16.vlgmr.msra.gmra.mrb[8].mxu0 %vm190_vm4, %v183_v34 }
 0x24f   :  { %1941 = vmatprep.mubr.msk.bf16.mxu0 %vm2241_vm0, %v2240_v0 }
 0x2b8   :  { %v337_v44 = vpop.permute.xlu0 %336  ;;  %v288_v45 = vpop.permute.xlu1 %287 }
 0x2b9   :  { %v342_v46 = vsel %vm190_vm4, %v337_v44, 0  ;;  %v293_v47 = vsel %vm190_vm4, %v288_v45, 0 }
 0x2ba   :  { %1940 = vmatpush3.bf16.xpose.msra.mxu0 %v293_v47  ;;  %1946 = vmatpush3.bf16.xpose.msra.mxu1 %v342_v46 }
 0x2bb   :  { %1951 = vmatprep.subr.bf16.mxu0 %v2240_v0  ;;  %1957 = vmatprep.subr.bf16.mxu1 %v2240_v0 }
 0x2c1   :  { %1942 = vmatmul.mubr.msk.bf16.vlgmr.msra.gmra.mrb[12].mxu0 %vm190_vm4, %v2339_v41  ;;  %1948 = vmatmul.mubr.msk.bf16.vlgmr.msra.gmra.mrb[4].mxu1 %vm190_vm4, %v2337_v40 }
 0x2c2   :  { %1953 = vmatprep.mubr.msk.bf16.mxu0 %vm2241_vm0, %v2240_v0  ;;  %1959 = vmatprep.mubr.msk.bf16.mxu1 %vm2241_vm0, %v2240_v0 }
 0x31d   :  { %v280_v48 = vpop.f32.mrb[0].mxu1 }
 0x31e   :  { %v1937_v49 = vpop.f32.mrb[1].mxu1  ;;  %v387_v50 = vsel %vm39_vm2, %v280_v48, -inf }
 0x31f   :  { %388 = vmax.xlane.f32.xlu0 %v387_v50  ;;  %v283_v51 = vpop.f32.mrb[2].mxu1 }
 0x320   :  { %v1938_v52 = vpop.f32.mrb[3].mxu1 }
 0x321   :  { %v231_v53 = vpop.f32.mrb[8].mxu0 }
 0x322   :  { %v1931_v54 = vpop.f32.mrb[9].mxu0  ;;  %v384_v55 = vsel %vm39_vm2, %v231_v53, -inf }
 0x323   :  { %385 = vmax.xlane.f32.xlu1 %v384_v55  ;;  %v234_v56 = vpop.f32.mrb[10].mxu0  ;;  %v2118_v54 = vld [vmem:[#allocation2 + $0x18] sm:$0xff]  }
 0x324   :  { %v1932_v57 = vpop.f32.mrb[11].mxu0 }
 0x394   :  { %v329_v58 = vpop.f32.mrb[12].mxu0  ;;  %v378_v59 = vpop.f32.mrb[4].mxu1 }
 0x395   :  { %v1943_v60 = vpop.f32.mrb[13].mxu0  ;;  %v1949_v61 = vpop.f32.mrb[5].mxu1  ;;  %v393_v62 = vsel %vm39_vm2, %v378_v59, -inf  ;;  %v390_v63 = vsel %vm39_vm2, %v329_v58, -inf }
 0x396   :  { %v381_v1 = vpop.f32.mrb[6].mxu1  ;;  %394 = vmax.xlane.f32.xlu1 %v393_v62  ;;  %391 = vmax.xlane.f32.xlu0 %v390_v63  ;;  %v332_v2 = vpop.f32.mrb[14].mxu0  ;;  %v2119_v63 = vld [vmem:[#allocation2 + $0x20] sm:$0xff]  }
 0x397   :  { %v1944_v3 = vpop.f32.mrb[15].mxu0  ;;  %v1950_v4 = vpop.f32.mrb[7].mxu1 }
 0x3a7   :  { %480 = vrot.lane.b32.xlu1 %v2330_v32, %s2238_s22 }
 0x3ac   :  { %432 = vrot.lane.b32.xlu0 %v183_v34, %s2238_s22  ;;  %v389_v5 = vpop.xlane.xlu0 %388 }
 0x3ad   :  { %v397_v7 = vsub.f32 %v280_v48, %v389_v5 }
 0x3af   :  { %v402_v11 = vmul.f32 1.442695, %v397_v7 }
 0x3b0   :  { %v386_v6 = vpop.xlane.xlu1 %385 }
 0x3b1   :  { %v396_v8 = vsub.f32 %v231_v53, %v386_v6  ;;  %2136 = vpow2.f32 %v402_v11 }
 0x3b3   :  { %v400_v12 = vmul.f32 1.442695, %v396_v8 }
 0x3b5   :  { %2138 = vpow2.f32 %v400_v12 }
 0x3bb   :  { %v2137_v13 = vpop.eup %2136 }
 0x3bc   :  { %v411_v15 = vsel %vm39_vm2, %v2137_v13, 0.0 }
 0x3bf   :  { %v2139_v14 = vpop.eup %2138 }
 0x3c0   :  { %v408_v16 = vsel %vm39_vm2, %v2139_v14, 0.0 }
 0x3cb   :  { %412 = vadd.xlane.f32.xlu1 %v411_v15  ;;  %409 = vadd.xlane.f32.xlu0 %v408_v16 }
 0x423   :  { %v395_v17 = vpop.xlane.xlu1 %394  ;;  %v392_v18 = vpop.xlane.xlu0 %391 }
 0x424   :  { %v399_v19 = vsub.f32 %v378_v59, %v395_v17  ;;  %v398_v20 = vsub.f32 %v329_v58, %v392_v18  ;;  %v2411_v18 = vsub.s32 1, %v2299_v9 }
 0x426   :  { %v406_v23 = vmul.f32 1.442695, %v399_v19  ;;  %v404_v25 = vmul.f32 1.442695, %v398_v20  ;;  %v638_v19 = vrot.slane %v2326_v24, %v2411_v18 }
 0x427   :  { %v481_v26 = vpop.permute.xlu1 %480  ;;  %v433_v27 = vpop.permute.xlu0 %432 }
 0x428   :  { %2140 = vpow2.f32 %v406_v23  ;;  %v486_v28 = vsel %vm43_vm1, %v481_v26, 0  ;;  %v438_v29 = vsel %vm43_vm1, %v433_v27, 0 }
 0x429   :  { %2142 = vpow2.f32 %v404_v25  ;;  %1952 = vmatpush3.bf16.msra.mxu0 %v438_v29  ;;  %1958 = vmatpush3.bf16.msra.mxu1 %v486_v28 }
 0x42a   :  { %1963 = vmatprep.subr.bf16.mxu0 %v2240_v0  ;;  %1969 = vmatprep.subr.bf16.mxu1 %v2240_v0 }
 0x432   :  { %v2141_v30 = vpop.eup %2140 }
 0x433   :  { %v2143_v31 = vpop.eup %2142  ;;  %v417_v32 = vsel %vm39_vm2, %v2141_v30, 0.0 }
 0x434   :  { %418 = vadd.xlane.f32.xlu1 %v417_v32  ;;  %v414_v33 = vsel %vm39_vm2, %v2143_v31, 0.0 }
 0x435   :  { %415 = vadd.xlane.f32.xlu0 %v414_v33 }
 0x445   :  { %528 = vrot.lane.b32.xlu1 %v2339_v41, %s2238_s22 }
 0x44b   :  { %576 = vrot.lane.b32.xlu0 %v2337_v40, %s2238_s22 }
 0x458   :  { %v413_v34 = vpop.xlane.xlu1 %412  ;;  %v410_v35 = vpop.xlane.xlu0 %409 }
 0x459   :  { %2144 = vrcp.f32 %v413_v34 }
 0x45a   :  { %2146 = vrcp.f32 %v410_v35 }
 0x463   :  { %v2145_v36 = vpop.eup %2144 }
 0x464   :  { %v2147_v37 = vpop.eup %2146  ;;  %v425_v38 = vmul.f32 %v2145_v36, %v2137_v13 }
 0x465   :  { %v424_v39 = vmul.f32 %v2147_v37, %v2139_v14 }
 0x466   :  { %v429_v42 = vpack.c.bf16 %v425_v38, %v425_v38 }
 0x467   :  { %v428_v43 = vpack.c.bf16 %v424_v39, %v424_v39 }
 0x468   :  { %1960 = vmatmul.mubr.msk.bf16.vlgmr.msra.gmra.mrb[8].mxu1 %vm39_vm2, %v429_v42 }
 0x469   :  { %1954 = vmatmul.mubr.msk.bf16.vlgmr.msra.gmra.mrb[16].mxu0 %vm39_vm2, %v428_v43  ;;  %1971 = vmatprep.mubr.msk.bf16.mxu1 %vm2241_vm0, %v2240_v0 }
 0x46a   :  { %1965 = vmatprep.mubr.msk.bf16.mxu0 %vm2241_vm0, %v2240_v0 }
 0x4c1   :  { %v419_v40 = vpop.xlane.xlu1 %418 }
 0x4c2   :  { %2148 = vrcp.f32 %v419_v40  ;;  %v416_v41 = vpop.xlane.xlu0 %415  ;;  %v2120_v40 = vld [vmem:[#allocation2 + $0x28] sm:$0xff]  }
 0x4c3   :  { %2150 = vrcp.f32 %v416_v41  ;;  %v2122_v41 = vld [vmem:[#allocation2 + $0x38] sm:$0xff]  }
 0x4c5   :  { %v529_v44 = vpop.permute.xlu1 %528 }
 0x4c6   :  { %v534_v45 = vsel %vm43_vm1, %v529_v44, 0  ;;  %v577_v46 = vpop.permute.xlu0 %576  ;;  %v2123_v44 = vld [vmem:[#allocation2 + $0x40] sm:$0xff]  }
 0x4c7   :  { %v582_v47 = vsel %vm43_vm1, %v577_v46, 0  ;;  %1964 = vmatpush3.bf16.msra.mxu0 %v534_v45 }
 0x4c8   :  { %1970 = vmatpush3.bf16.msra.mxu1 %v582_v47  ;;  %1975 = vmatprep.subr.bf16.mxu0 %v2240_v0 }
 0x4c9   :  { %1983 = vmatprep.subr.bf16.mxu1 %v2240_v0 }
 0x4cc   :  { %v2149_v48 = vpop.eup %2148 }
 0x4cd   :  { %v2151_v49 = vpop.eup %2150  ;;  %v427_v50 = vmul.f32 %v2149_v48, %v2141_v30 }
 0x4ce   :  { %v426_v51 = vmul.f32 %v2151_v49, %v2143_v31 }
 0x4cf   :  { %v431_v52 = vpack.c.bf16 %v427_v50, %v427_v50 }
 0x4d0   :  { %v430_v53 = vpack.c.bf16 %v426_v51, %v426_v51  ;;  %v2426_v51 = vsub.s32 2, %v2299_v9 }
 0x4d1   :  { %1972 = vmatmul.mubr.msk.bf16.vlgmr.msra.gmra.mrb[12].mxu1 %vm39_vm2, %v431_v52 }
 0x4d2   :  { %1966 = vmatmul.mubr.msk.bf16.vlgmr.msra.gmra.mrb[20].mxu0 %vm39_vm2, %v430_v53  ;;  %1987 = vmatprep.mubr.msk.bf16.mxu1 %vm2241_vm0, %v2240_v0  ;;  %v727_v53 = vrot.slane %v2326_v24, %v2426_v51 }
 0x4d3   :  { %1979 = vmatprep.mubr.msk.bf16.mxu0 %vm2241_vm0, %v2240_v0  ;;  %1976 = vmatpush3.bf16.msra.mxu0 %v2118_v54 }
 0x4d4   :  { %1977 = vmatprep.subr.bf16.mxu0 %v2240_v0  ;;  %1984 = vmatpush3.bf16.msra.mxu1 %v2120_v40  ;;  %v2127_v40 = vld [vmem:[#allocation2 + $0x60] sm:$0xff]  }
 0x4d5   :  { %1985 = vmatprep.subr.bf16.mxu1 %v2240_v0 }
 0x4d7   :  { %1978 = vmatpush3.bf16.msra.mxu0 %v2119_v63 }
 0x4d8   :  { %1991 = vmatprep.subr.bf16.mxu0 %v2240_v0 }
 0x53b   :  { %v522_v55 = vpop.f32.mrb[8].mxu1 }
 0x53c   :  { %v474_v56 = vpop.f32.mrb[16].mxu0  ;;  %v1961_v57 = vpop.f32.mrb[9].mxu1 }
 0x53d   :  { %v1955_v58 = vpop.f32.mrb[17].mxu0  ;;  %v525_v59 = vpop.f32.mrb[10].mxu1 }
 0x53e   :  { %v477_v60 = vpop.f32.mrb[18].mxu0  ;;  %v1962_v61 = vpop.f32.mrb[11].mxu1 }
 0x53f   :  { %v1956_v62 = vpop.f32.mrb[19].mxu0 }
 0x5a4   :  { %v618_v1 = vpop.f32.mrb[12].mxu1 }
 0x5a5   :  { %v570_v2 = vpop.f32.mrb[20].mxu0  ;;  %v1973_v3 = vpop.f32.mrb[13].mxu1 }
 0x5a6   :  { %v2101_v4 = vpack.i.bf16 %v618_v1, %v570_v2  ;;  %v1967_v5 = vpop.f32.mrb[21].mxu0  ;;  %v621_v6 = vpop.f32.mrb[14].mxu1  ;;  %v2124_v1 = vld [vmem:[#allocation2 + $0x48] sm:$0xff]   ;;  %v2125_v2 = vld [vmem:[#allocation2 + $0x50] sm:$0xff]   ;;  %v739_v3 = vsub.s32 4, %v2299_v9 }
 0x5a7   :  { %v573_v7 = vpop.f32.mrb[22].mxu0  ;;  %v1974_v8 = vpop.f32.mrb[15].mxu1 }
 0x5a8   :  { %2102 = vrot.lane.b32.xlu1 %v2101_v4, %s2244_s11  ;;  %v1968_v11 = vpop.f32.mrb[23].mxu0  ;;  %v740_v4 = vrot.slane %v2326_v24, %v739_v3 }
 0x61a   :  { %v2103_v12 = vpop.permute.xlu1 %2102 }
 0x61b   :  { %v2105_v13 = vunpack.i.h.bf16 %v2103_v12  ;;  %v2104_v14 = vunpack.i.l.bf16 %v2103_v12 }
 0x61d   :  { %v633_v15 = vsel %vm190_vm4, %v522_v55, %v2105_v13  ;;  %v632_v16 = vsel %vm190_vm4, %v474_v56, %v2104_v14  ;;  %v732_v55 = vsub.s32 3, %v2299_v9 }
 0x61e   :  { %v634_v17 = vpack.c.bf16 %v633_v15, %v632_v16  ;;  %v802_v16 = vsub.s32 5, %v2299_v9 }
 0x61f   :  { %v733_v59 = vrot.slane %v2326_v24, %v732_v55 }
 0x620   :  { %1980 = vmatmul.mubr.msk.bf16.vlgmr.msra.gmra.mrb[24].mxu0 %vm130_vm3, %v634_v17  ;;  %v803_v17 = vrot.slane %v2326_v24, %v802_v16 }
 0x621   :  { %1999 = vmatprep.mubr.msk.bf16.mxu0 %vm2241_vm0, %v2240_v0  ;;  %1992 = vmatpush3.bf16.msra.mxu0 %v2122_v41 }
 0x622   :  { %1993 = vmatprep.subr.bf16.mxu0 %v2240_v0 }
 0x625   :  { %1994 = vmatpush3.bf16.msra.mxu0 %v2123_v44 }
 0x626   :  { %1995 = vmatprep.subr.bf16.mxu0 %v2240_v0 }
 0x629   :  { %1996 = vmatpush3.bf16.msra.mxu0 %v2124_v1 }
 0x62a   :  { %1997 = vmatprep.subr.bf16.mxu0 %v2240_v0 }
 0x62d   :  { %1998 = vmatpush3.bf16.msra.mxu0 %v2125_v2 }
 0x62e   :  { %2017 = vmatprep.subr.bf16.mxu0 %v2240_v0 }
 0x6f3   :  { %v688_v20 = vpop.f32.mrb[24].mxu0 }
 0x6f4   :  { %v689_v23 = vadd.f32 %v688_v20, %v638_v19  ;;  %v1981_v25 = vpop.f32.mrb[25].mxu0 }
 0x6f5   :  { %v691_v26 = vpop.f32.mrb[26].mxu0 }
 0x6f6   :  { %v692_v27 = vadd.f32 %v691_v26, %v638_v19  ;;  %v1982_v28 = vpop.f32.mrb[27].mxu0  ;;  %v695_v29 = vadd.f32 %v689_v23, %v2314_v21 }
 0x6f8   :  { %v697_v30 = vsel %vm130_vm3, %v695_v29, 0.0  ;;  %v696_v31 = vadd.f32 %v692_v27, %v2316_v22  ;;  %v2121_v22 = vld [vmem:[#allocation2 + $0x30] sm:$0xff]  }
 0x6f9   :  { %698 = vadd.xlane.f32.xlu0 %v697_v30  ;;  %1986 = vmatpush3.bf16.msra.mxu1 %v2121_v22 }
 0x6fa   :  { %v700_v32 = vsel %vm130_vm3, %v696_v31, 0.0  ;;  %2003 = vmatprep.subr.bf16.mxu1 %v2240_v0 }
 0x6fb   :  { %701 = vadd.xlane.f32.xlu1 %v700_v32 }
 0x786   :  { %v699_v33 = vpop.xlane.xlu0 %698 }
 0x787   :  { %v704_v34 = vmul.f32 0.03125, %v699_v33 }
 0x788   :  { %v702_v35 = vpop.xlane.xlu1 %701 }
 0x789   :  { %v706_v36 = vsub.f32 %v695_v29, %v704_v34  ;;  %v705_v37 = vmul.f32 0.03125, %v702_v35 }
 0x78b   :  { %v707_v38 = vsub.f32 %v696_v31, %v705_v37  ;;  %v708_v39 = vmul.f32 %v706_v36, %v706_v36 }
 0x78d   :  { %v710_v42 = vsel %vm130_vm3, %v708_v39, 0.0  ;;  %v709_v43 = vmul.f32 %v707_v38, %v707_v38 }
 0x78e   :  { %711 = vadd.xlane.f32.xlu0 %v710_v42 }
 0x78f   :  { %v713_v21 = vsel %vm130_vm3, %v709_v43, 0.0 }
 0x792   :  { %714 = vadd.xlane.f32.xlu0 %v713_v21  ;;  %v2126_v21 = vld [vmem:[#allocation2 + $0x58] sm:$0xff]  }
 0x81b   :  { %v712_v45 = vpop.xlane.xlu0 %711 }
 0x81c   :  { %v716_v46 = vmul.f32 0.03125, %v712_v45 }
 0x81e   :  { %v718_v47 = vadd.f32 1e-05, %v716_v46 }
 0x81f   :  { %v715_v48 = vpop.xlane.xlu0 %714 }
 0x820   :  { %2152 = vrsqrt.f32 %v718_v47  ;;  %v717_v49 = vmul.f32 0.03125, %v715_v48  ;;  %v903_v48 = vsub.s32 6, %v2299_v9 }
 0x822   :  { %v719_v50 = vadd.f32 1e-05, %v717_v49  ;;  %v904_v49 = vrot.slane %v2326_v24, %v903_v48 }
 0x824   :  { %2154 = vrsqrt.f32 %v719_v50  ;;  %v909_v50 = vsub.s32 7, %v2299_v9 }
 0x82a   :  { %v2153_v52 = vpop.eup %2152 }
 0x82b   :  { %v722_v54 = vmul.f32 %v2153_v52, %v706_v36 }
 0x82d   :  { %v728_v57 = vmul.f32 %v727_v53, %v722_v54 }
 0x82e   :  { %v2155_v56 = vpop.eup %2154 }
 0x82f   :  { %v723_v58 = vmul.f32 %v2155_v56, %v707_v38  ;;  %v734_v61 = vadd.f32 %v733_v59, %v728_v57 }
 0x831   :  { %v729_v60 = vmul.f32 %v727_v53, %v723_v58  ;;  %v910_v58 = vrot.slane %v2326_v24, %v909_v50 }
 0x833   :  { %v735_v62 = vadd.f32 %v733_v59, %v729_v60 }
 0x835   :  { %v736_v63 = vpack.c.bf16 %v735_v62, %v734_v61 }
 0x837   :  { %1988 = vmatmul.mubr.msk.bf16.vlgmr.msra.gmra.mrb[16].mxu1 %vm130_vm3, %v736_v63  ;;  %v2476_v63 = vld [vmem:[%s2620_s2 + $0x20] sm:$0xff] }
 0x838   :  { %2007 = vmatprep.mubr.msk.bf16.mxu1 %vm2241_vm0, %v2240_v0  ;;  %2004 = vmatpush3.bf16.msra.mxu1 %v2126_v21  ;;  %v938_v24 = vrot.slane %v2476_v63, %v2302_v10 }
 0x839   :  { %2005 = vmatprep.subr.bf16.mxu1 %v2240_v0 }
 0x83c   :  { %2006 = vmatpush3.bf16.msra.mxu1 %v2127_v40 }
 0x83d   :  { %2011 = vmatprep.subr.bf16.mxu1 %v2240_v0 }
 0x90a   :  { %v790_v5 = vpop.f32.mrb[16].mxu1 }
 0x90b   :  { %v791_v6 = vadd.f32 %v790_v5, %v740_v4  ;;  %v1989_v7 = vpop.f32.mrb[17].mxu1 }
 0x90c   :  { %v793_v8 = vpop.f32.mrb[18].mxu1 }
 0x90d   :  { %v794_v11 = vadd.f32 %v793_v8, %v740_v4  ;;  %v1990_v12 = vpop.f32.mrb[19].mxu1  ;;  %v797_v13 = vmax.f32 %v791_v6, 0.0 }
 0x90f   :  { %v798_v14 = vmax.f32 %v794_v11, 0.0 }
 0x911   :  { %v799_v15 = vpack.c.bf16 %v798_v14, %v797_v13 }
 0x913   :  { %2000 = vmatmul.mubr.msk.bf16.vlgmr.msra.gmra.mrb[28].mxu0 %vm828_vm5, %v799_v15 }
 0x914   :  { %2019 = vmatprep.mubr.msk.bf16.mxu0 %vm2241_vm0, %v2240_v0 }
 0x9e6   :  { %v866_v19 = vpop.f32.mrb[28].mxu0 }
 0x9e7   :  { %v867_v20 = vadd.f32 %v866_v19, %v803_v17  ;;  %v2001_v23 = vpop.f32.mrb[29].mxu0 }
 0x9e8   :  { %v869_v25 = vpop.f32.mrb[30].mxu0 }
 0x9e9   :  { %v870_v26 = vadd.f32 %v869_v25, %v803_v17  ;;  %v2002_v27 = vpop.f32.mrb[31].mxu0  ;;  %v873_v28 = vadd.f32 %v867_v20, %v734_v61 }
 0x9eb   :  { %v875_v29 = vsel %vm130_vm3, %v873_v28, 0.0  ;;  %v874_v30 = vadd.f32 %v870_v26, %v735_v62 }
 0x9ec   :  { %876 = vadd.xlane.f32.xlu1 %v875_v29 }
 0x9ed   :  { %v878_v31 = vsel %vm130_vm3, %v874_v30, 0.0 }
 0x9ee   :  { %879 = vadd.xlane.f32.xlu0 %v878_v31 }
 0xa79   :  { %v877_v32 = vpop.xlane.xlu1 %876 }
 0xa7a   :  { %v881_v33 = vmul.f32 0.03125, %v877_v32 }
 0xa7b   :  { %v880_v34 = vpop.xlane.xlu0 %879 }
 0xa7c   :  { %v883_v35 = vsub.f32 %v873_v28, %v881_v33  ;;  %v882_v36 = vmul.f32 0.03125, %v880_v34 }
 0xa7e   :  { %v884_v37 = vsub.f32 %v874_v30, %v882_v36  ;;  %v885_v38 = vmul.f32 %v883_v35, %v883_v35 }
 0xa80   :  { %v887_v39 = vsel %vm130_vm3, %v885_v38, 0.0  ;;  %v886_v42 = vmul.f32 %v884_v37, %v884_v37 }
 0xa81   :  { %888 = vadd.xlane.f32.xlu1 %v887_v39 }
 0xa82   :  { %v890_v43 = vsel %vm130_vm3, %v886_v42, 0.0 }
 0xa83   :  { %891 = vadd.xlane.f32.xlu0 %v890_v43 }
 0xb0e   :  { %v889_v22 = vpop.xlane.xlu1 %888 }
 0xb0f   :  { %v893_v41 = vmul.f32 0.03125, %v889_v22 }
 0xb10   :  { %v892_v44 = vpop.xlane.xlu0 %891 }
 0xb11   :  { %v895_v45 = vadd.f32 1e-05, %v893_v41  ;;  %v894_v46 = vmul.f32 0.03125, %v892_v44 }
 0xb13   :  { %2156 = vrsqrt.f32 %v895_v45  ;;  %v896_v47 = vadd.f32 1e-05, %v894_v46 }
 0xb15   :  { %2158 = vrsqrt.f32 %v896_v47 }
 0xb1d   :  { %v2157_v52 = vpop.eup %2156 }
 0xb1e   :  { %v899_v53 = vmul.f32 %v2157_v52, %v883_v35 }
 0xb1f   :  { %v2159_v54 = vpop.eup %2158 }
 0xb20   :  { %v905_v56 = vmul.f32 %v904_v49, %v899_v53  ;;  %v900_v57 = vmul.f32 %v2159_v54, %v884_v37 }
 0xb22   :  { %v906_v59 = vmul.f32 %v904_v49, %v900_v57  ;;  %v2464_v60 = vadd.f32 %v910_v58, %v905_v56 }
 0xb24   :  { %v2466_v61 = vadd.f32 %v910_v58, %v906_v59 }
 0xb26   :  { %v934_v62 = vpack.c.bf16 %v2466_v61, %v2464_v60 }
 0xb28   :  { %2008 = vmatmul.mubr.msk.bf16.vlgmr.msra.gmra.mrb[20].mxu1 %vm130_vm3, %v934_v62 }
 0xb29   :  { %2013 = vmatprep.mubr.msk.bf16.mxu1 %vm2241_vm0, %v2240_v0 }
 0xbfb   :  { %v988_v1 = vpop.f32.mrb[20].mxu1 }
 0xbfc   :  { %v989_v2 = vadd.f32 %v988_v1, %v938_v24  ;;  %v2009_v4 = vpop.f32.mrb[21].mxu1 }
 0xbfd   :  { %v991_v5 = vpop.f32.mrb[22].mxu1 }
 0xbfe   :  { %v2480_v6 = vpack.c.bf16 %v989_v2, %v989_v2  ;;  %v992_v7 = vadd.f32 %v991_v5, %v938_v24  ;;  %v2010_v8 = vpop.f32.mrb[23].mxu1 }
 0xc00   :  { %v2106_v11 = vpack.i.bf16 %v992_v7, %v989_v2  ;;  %1008 = vrot.lane.b32.xlu0 %v2480_v6, %s2243_s10  ;;  %v1004_v12 = vpack.c.bf16 %v992_v7, %v992_v7 }
 0xc02   :  { %2107 = vrot.lane.b32.xlu1 %v2106_v11, %s2242_s9 }
 0xc06   :  { %1057 = vrot.lane.b32.xlu1 %v1004_v12, %s2243_s10 }
 0xc72   :  { %v1009_v13 = vpop.permute.xlu0 %1008 }
 0xc73   :  { %v1014_v10 = vsel %vm190_vm4, %v1009_v13, 0 }
 0xc74   :  { %2012 = vmatpush3.bf16.xpose.msra.mxu1 %v1014_v10  ;;  %v2108_v14 = vpop.permute.xlu1 %2107 }
 0xc75   :  { %v2110_v15 = vunpack.i.h.bf16 %v2108_v14  ;;  %v2109_v17 = vunpack.i.l.bf16 %v2108_v14  ;;  %2023 = vmatprep.subr.bf16.mxu1 %v2240_v0 }
 0xc77   :  { %v2488_v19 = vpack.c.bf16 %v2110_v15, %v2110_v15  ;;  %v2490_v20 = vpack.c.bf16 %v2109_v17, %v2109_v17 }
 0xc78   :  { %v1058_v23 = vpop.permute.xlu1 %1057 }
 0xc79   :  { %v1063_v25 = vsel %vm190_vm4, %v1058_v23, 0  ;;  %1155 = vrot.lane.b32.xlu0 %v2488_v19, %s2243_s10  ;;  %1106 = vrot.lane.b32.xlu1 %v2490_v20, %s2243_s10 }
 0xc7a   :  { %2018 = vmatpush3.bf16.xpose.msra.mxu0 %v1063_v25 }
 0xc7b   :  { %2014 = vmatmul.mubr.msk.bf16.vlgmr.msra.gmra.mrb[24].mxu1 %vm190_vm4, %v2480_v6  ;;  %2029 = vmatprep.subr.bf16.mxu0 %v2240_v0 }
 0xc7c   :  { %2025 = vmatprep.mubr.msk.bf16.mxu1 %vm2241_vm0, %v2240_v0 }
 0xc81   :  { %2020 = vmatmul.mubr.msk.bf16.vlgmr.msra.gmra.mrb[32].mxu0 %vm190_vm4, %v1004_v12 }
 0xc82   :  { %2031 = vmatprep.mubr.msk.bf16.mxu0 %vm2241_vm0, %v2240_v0 }
 0xceb   :  { %v1156_v26 = vpop.permute.xlu0 %1155  ;;  %v1107_v27 = vpop.permute.xlu1 %1106 }
 0xcec   :  { %v1161_v28 = vsel %vm190_vm4, %v1156_v26, 0  ;;  %v1112_v29 = vsel %vm190_vm4, %v1107_v27, 0 }
 0xced   :  { %2024 = vmatpush3.bf16.xpose.msra.mxu1 %v1112_v29  ;;  %2030 = vmatpush3.bf16.xpose.msra.mxu0 %v1161_v28 }
 0xcee   :  { %2035 = vmatprep.subr.bf16.mxu1 %v2240_v0  ;;  %2041 = vmatprep.subr.bf16.mxu0 %v2240_v0 }
 0xcf4   :  { %2026 = vmatmul.mubr.msk.bf16.vlgmr.msra.gmra.mrb[28].mxu1 %vm190_vm4, %v2490_v20  ;;  %2032 = vmatmul.mubr.msk.bf16.vlgmr.msra.gmra.mrb[36].mxu0 %vm190_vm4, %v2488_v19 }
 0xcf5   :  { %2037 = vmatprep.mubr.msk.bf16.mxu1 %vm2241_vm0, %v2240_v0  ;;  %2043 = vmatprep.mubr.msk.bf16.mxu0 %vm2241_vm0, %v2240_v0 }
 0xd4e   :  { %v1050_v30 = vpop.f32.mrb[24].mxu1 }
 0xd4f   :  { %v2015_v31 = vpop.f32.mrb[25].mxu1  ;;  %v1203_v32 = vsel %vm39_vm2, %v1050_v30, -inf }
 0xd50   :  { %1204 = vmax.xlane.f32.xlu1 %v1203_v32  ;;  %v1053_v33 = vpop.f32.mrb[26].mxu1 }
 0xd51   :  { %v2016_v34 = vpop.f32.mrb[27].mxu1 }
 0xd54   :  { %v1099_v35 = vpop.f32.mrb[32].mxu0 }
 0xd55   :  { %v2021_v36 = vpop.f32.mrb[33].mxu0  ;;  %v1206_v37 = vsel %vm39_vm2, %v1099_v35, -inf }
 0xd56   :  { %1207 = vmax.xlane.f32.xlu0 %v1206_v37  ;;  %v1102_v38 = vpop.f32.mrb[34].mxu0 }
 0xd57   :  { %v2022_v39 = vpop.f32.mrb[35].mxu0 }
 0xdc7   :  { %v1148_v42 = vpop.f32.mrb[28].mxu1  ;;  %v1197_v43 = vpop.f32.mrb[36].mxu0 }
 0xdc8   :  { %v2027_v21 = vpop.f32.mrb[29].mxu1  ;;  %v2033_v40 = vpop.f32.mrb[37].mxu0  ;;  %v1209_v22 = vsel %vm39_vm2, %v1148_v42, -inf  ;;  %v1212_v41 = vsel %vm39_vm2, %v1197_v43, -inf }
 0xdc9   :  { %v1151_v44 = vpop.f32.mrb[30].mxu1  ;;  %1210 = vmax.xlane.f32.xlu0 %v1209_v22  ;;  %1213 = vmax.xlane.f32.xlu1 %v1212_v41  ;;  %v1200_v45 = vpop.f32.mrb[38].mxu0  ;;  %v2128_v21 = vld [vmem:[#allocation2 + $0x68] sm:$0xff]  }
 0xdca   :  { %v2028_v46 = vpop.f32.mrb[31].mxu1  ;;  %v2034_v47 = vpop.f32.mrb[39].mxu0 }
 0xdda   :  { %1299 = vrot.lane.b32.xlu1 %v1004_v12, %s2238_s22 }
 0xddd   :  { %v1205_v49 = vpop.xlane.xlu1 %1204 }
 0xdde   :  { %v1215_v53 = vsub.f32 %v1050_v30, %v1205_v49 }
 0xddf   :  { %1251 = vrot.lane.b32.xlu0 %v2480_v6, %s2238_s22 }
 0xde0   :  { %v1219_v56 = vmul.f32 1.442695, %v1215_v53 }
 0xde2   :  { %2160 = vpow2.f32 %v1219_v56 }
 0xde3   :  { %v1208_v52 = vpop.xlane.xlu0 %1207 }
 0xde4   :  { %v1216_v54 = vsub.f32 %v1099_v35, %v1208_v52  ;;  %v2129_v52 = vld [vmem:[#allocation2 + $0x70] sm:$0xff]  }
 0xde6   :  { %v1221_v57 = vmul.f32 1.442695, %v1216_v54 }
 0xde8   :  { %2162 = vpow2.f32 %v1221_v57 }
 0xdec   :  { %v2161_v58 = vpop.eup %2160 }
 0xded   :  { %v1227_v62 = vsel %vm39_vm2, %v2161_v58, 0.0 }
 0xdf2   :  { %v2163_v59 = vpop.eup %2162 }
 0xdf3   :  { %v1230_v24 = vsel %vm39_vm2, %v2163_v59, 0.0 }
 0xdfe   :  { %1228 = vadd.xlane.f32.xlu0 %v1227_v62  ;;  %1231 = vadd.xlane.f32.xlu1 %v1230_v24 }
 0xe56   :  { %v1211_v1 = vpop.xlane.xlu0 %1210  ;;  %v1214_v2 = vpop.xlane.xlu1 %1213 }
 0xe57   :  { %v1217_v4 = vsub.f32 %v1148_v42, %v1211_v1  ;;  %v1218_v5 = vsub.f32 %v1197_v43, %v1214_v2 }
 0xe59   :  { %v1223_v6 = vmul.f32 1.442695, %v1217_v4  ;;  %v1225_v7 = vmul.f32 1.442695, %v1218_v5 }
 0xe5a   :  { %v1252_v8 = vpop.permute.xlu0 %1251  ;;  %v1300_v11 = vpop.permute.xlu1 %1299 }
 0xe5b   :  { %2164 = vpow2.f32 %v1223_v6  ;;  %v1257_v12 = vsel %vm43_vm1, %v1252_v8, 0  ;;  %v1305_v13 = vsel %vm43_vm1, %v1300_v11, 0  ;;  %v1457_v11 = vrot.slane %v2476_v63, %v2411_v18 }
 0xe5c   :  { %2166 = vpow2.f32 %v1225_v7  ;;  %2036 = vmatpush3.bf16.msra.mxu1 %v1257_v12  ;;  %2042 = vmatpush3.bf16.msra.mxu0 %v1305_v13 }
 0xe5d   :  { %2047 = vmatprep.subr.bf16.mxu1 %v2240_v0  ;;  %2053 = vmatprep.subr.bf16.mxu0 %v2240_v0 }
 0xe65   :  { %v2165_v10 = vpop.eup %2164 }
 0xe66   :  { %v2167_v14 = vpop.eup %2166  ;;  %v1233_v15 = vsel %vm39_vm2, %v2165_v10, 0.0 }
 0xe67   :  { %1234 = vadd.xlane.f32.xlu0 %v1233_v15  ;;  %v1236_v17 = vsel %vm39_vm2, %v2167_v14, 0.0 }
 0xe68   :  { %1237 = vadd.xlane.f32.xlu1 %v1236_v17 }
 0xe79   :  { %1347 = vrot.lane.b32.xlu1 %v2490_v20, %s2238_s22 }
 0xe7d   :  { %1395 = vrot.lane.b32.xlu0 %v2488_v19, %s2238_s22 }
 0xe8b   :  { %v1229_v23 = vpop.xlane.xlu0 %1228  ;;  %v1232_v25 = vpop.xlane.xlu1 %1231 }
 0xe8c   :  { %2168 = vrcp.f32 %v1229_v23 }
 0xe8d   :  { %2170 = vrcp.f32 %v1232_v25 }
 0xe96   :  { %v2169_v26 = vpop.eup %2168 }
 0xe97   :  { %v2171_v27 = vpop.eup %2170  ;;  %v1243_v28 = vmul.f32 %v2169_v26, %v2161_v58 }
 0xe98   :  { %v1244_v29 = vmul.f32 %v2171_v27, %v2163_v59 }
 0xe99   :  { %v1247_v30 = vpack.c.bf16 %v1243_v28, %v1243_v28 }
 0xe9a   :  { %v1248_v31 = vpack.c.bf16 %v1244_v29, %v1244_v29 }
 0xe9b   :  { %2038 = vmatmul.mubr.msk.bf16.vlgmr.msra.gmra.mrb[32].mxu1 %vm39_vm2, %v1247_v30 }
 0xe9c   :  { %2044 = vmatmul.mubr.msk.bf16.vlgmr.msra.gmra.mrb[40].mxu0 %vm39_vm2, %v1248_v31  ;;  %2049 = vmatprep.mubr.msk.bf16.mxu1 %vm2241_vm0, %v2240_v0 }
 0xe9d   :  { %2055 = vmatprep.mubr.msk.bf16.mxu0 %vm2241_vm0, %v2240_v0 }
 0xef4   :  { %v1235_v19 = vpop.xlane.xlu0 %1234 }
 0xef5   :  { %2172 = vrcp.f32 %v1235_v19  ;;  %v1238_v20 = vpop.xlane.xlu1 %1237 }
 0xef6   :  { %2174 = vrcp.f32 %v1238_v20 }
 0xef8   :  { %v1396_v32 = vpop.permute.xlu0 %1395 }
 0xef9   :  { %v1401_v33 = vsel %vm43_vm1, %v1396_v32, 0  ;;  %v1348_v34 = vpop.permute.xlu1 %1347 }
 0xefa   :  { %v1353_v35 = vsel %vm43_vm1, %v1348_v34, 0  ;;  %2054 = vmatpush3.bf16.msra.mxu0 %v1401_v33 }
 0xefb   :  { %2048 = vmatpush3.bf16.msra.mxu1 %v1353_v35  ;;  %2067 = vmatprep.subr.bf16.mxu0 %v2240_v0  ;;  %v2130_v35 = vld [vmem:[#allocation2 + $0x78] sm:$0xff]  }
 0xefc   :  { %2059 = vmatprep.subr.bf16.mxu1 %v2240_v0 }
 0xeff   :  { %v2173_v36 = vpop.eup %2172 }
 0xf00   :  { %v2175_v37 = vpop.eup %2174  ;;  %v1245_v38 = vmul.f32 %v2173_v36, %v2165_v10  ;;  %v2132_v36 = vld [vmem:[#allocation2 + $0x88] sm:$0xff]  }
 0xf01   :  { %v1246_v39 = vmul.f32 %v2175_v37, %v2167_v14  ;;  %v2133_v37 = vld [vmem:[#allocation2 + $0x90] sm:$0xff]  }
 0xf02   :  { %v1249_v42 = vpack.c.bf16 %v1245_v38, %v1245_v38 }
 0xf03   :  { %v1250_v43 = vpack.c.bf16 %v1246_v39, %v1246_v39 }
 0xf04   :  { %2050 = vmatmul.mubr.msk.bf16.vlgmr.msra.gmra.mrb[36].mxu1 %vm39_vm2, %v1249_v42 }
 0xf05   :  { %2056 = vmatmul.mubr.msk.bf16.vlgmr.msra.gmra.mrb[44].mxu0 %vm39_vm2, %v1250_v43  ;;  %2063 = vmatprep.mubr.msk.bf16.mxu1 %vm2241_vm0, %v2240_v0 }
 0xf06   :  { %2071 = vmatprep.mubr.msk.bf16.mxu0 %vm2241_vm0, %v2240_v0  ;;  %2060 = vmatpush3.bf16.msra.mxu1 %v2128_v21 }
 0xf07   :  { %2061 = vmatprep.subr.bf16.mxu1 %v2240_v0  ;;  %2068 = vmatpush3.bf16.msra.mxu0 %v2130_v35 }
 0xf08   :  { %2069 = vmatprep.subr.bf16.mxu0 %v2240_v0 }
 0xf0a   :  { %2062 = vmatpush3.bf16.msra.mxu1 %v2129_v52 }
 0xf0b   :  { %2075 = vmatprep.subr.bf16.mxu1 %v2240_v0 }
 0xf6e   :  { %v1293_v40 = vpop.f32.mrb[32].mxu1 }
 0xf6f   :  { %v1341_v22 = vpop.f32.mrb[40].mxu0  ;;  %v2039_v41 = vpop.f32.mrb[33].mxu1 }
 0xf70   :  { %v2045_v44 = vpop.f32.mrb[41].mxu0  ;;  %v1296_v45 = vpop.f32.mrb[34].mxu1  ;;  %v1545_v41 = vrot.slane %v2476_v63, %v2426_v51 }
 0xf71   :  { %v1344_v46 = vpop.f32.mrb[42].mxu0  ;;  %v2040_v47 = vpop.f32.mrb[35].mxu1 }
 0xf72   :  { %v2046_v49 = vpop.f32.mrb[43].mxu0 }
 0xf73   :  { %v1551_v49 = vrot.slane %v2476_v63, %v732_v55 }
 0xfd7   :  { %v1389_v53 = vpop.f32.mrb[36].mxu1 }
 0xfd8   :  { %v1437_v54 = vpop.f32.mrb[44].mxu0  ;;  %v2051_v56 = vpop.f32.mrb[37].mxu1 }
 0xfd9   :  { %v2111_v57 = vpack.i.bf16 %v1437_v54, %v1389_v53  ;;  %v2057_v58 = vpop.f32.mrb[45].mxu0  ;;  %v1392_v59 = vpop.f32.mrb[38].mxu1 }
 0xfda   :  { %v1440_v62 = vpop.f32.mrb[46].mxu0  ;;  %v2052_v24 = vpop.f32.mrb[39].mxu1  ;;  %v2135_v58 = vld [vmem:[#allocation2 + $0xa0] sm:$0xff]   ;;  %v1558_v59 = vrot.slane %v2476_v63, %v739_v3 }
 0xfdb   :  { %2112 = vrot.lane.b32.xlu1 %v2111_v57, %s2244_s11  ;;  %v2058_v1 = vpop.f32.mrb[47].mxu0  ;;  %v2134_v57 = vld [vmem:[#allocation2 + $0x98] sm:$0xff]  }
0x104d   :  { %v2113_v2 = vpop.permute.xlu1 %2112 }
0x104e   :  { %v2115_v4 = vunpack.i.h.bf16 %v2113_v2  ;;  %v2114_v5 = vunpack.i.l.bf16 %v2113_v2 }
0x1050   :  { %v1452_v6 = vsel %vm190_vm4, %v1341_v22, %v2115_v4  ;;  %v1451_v7 = vsel %vm190_vm4, %v1293_v40, %v2114_v5 }
0x1051   :  { %v1453_v8 = vpack.c.bf16 %v1452_v6, %v1451_v7 }
0x1053   :  { %2064 = vmatmul.mubr.msk.bf16.vlgmr.msra.gmra.mrb[40].mxu1 %vm130_vm3, %v1453_v8 }
0x1054   :  { %2083 = vmatprep.mubr.msk.bf16.mxu1 %vm2241_vm0, %v2240_v0  ;;  %2076 = vmatpush3.bf16.msra.mxu1 %v2132_v36  ;;  %v1721_v36 = vrot.slane %v2476_v63, %v903_v48 }
0x1055   :  { %2077 = vmatprep.subr.bf16.mxu1 %v2240_v0 }
0x1058   :  { %2078 = vmatpush3.bf16.msra.mxu1 %v2133_v37 }
0x1059   :  { %2079 = vmatprep.subr.bf16.mxu1 %v2240_v0 }
0x105c   :  { %2080 = vmatpush3.bf16.msra.mxu1 %v2134_v57 }
0x105d   :  { %2081 = vmatprep.subr.bf16.mxu1 %v2240_v0  ;;  %v1621_v0 = vrot.slane %v2476_v63, %v802_v16 }
0x1060   :  { %2082 = vmatpush3.bf16.msra.mxu1 %v2135_v58 }
0x1126   :  { %v1507_v12 = vpop.f32.mrb[40].mxu1 }
0x1127   :  { %v1508_v13 = vadd.f32 %v1507_v12, %v1457_v11  ;;  %v2065_v10 = vpop.f32.mrb[41].mxu1 }
0x1128   :  { %v1510_v14 = vpop.f32.mrb[42].mxu1 }
0x1129   :  { %v1511_v15 = vadd.f32 %v1510_v14, %v1457_v11  ;;  %v2066_v17 = vpop.f32.mrb[43].mxu1  ;;  %v1514_v23 = vadd.f32 %v1508_v13, %v2464_v60 }
0x112b   :  { %v1516_v25 = vsel %vm130_vm3, %v1514_v23, 0.0  ;;  %v1515_v26 = vadd.f32 %v1511_v15, %v2466_v61  ;;  %v2131_v61 = vld [vmem:[#allocation2 + $0x80] sm:$0xff]  }
0x112c   :  { %1517 = vadd.xlane.f32.xlu0 %v1516_v25  ;;  %2070 = vmatpush3.bf16.msra.mxu0 %v2131_v61 }
0x112d   :  { %v1519_v27 = vsel %vm130_vm3, %v1515_v26, 0.0 }
0x112e   :  { %1520 = vadd.xlane.f32.xlu1 %v1519_v27 }
0x11b9   :  { %v1518_v28 = vpop.xlane.xlu0 %1517 }
0x11ba   :  { %v1522_v29 = vmul.f32 0.03125, %v1518_v28 }
0x11bb   :  { %v1521_v30 = vpop.xlane.xlu1 %1520 }
0x11bc   :  { %v1524_v31 = vsub.f32 %v1514_v23, %v1522_v29  ;;  %v1523_v19 = vmul.f32 0.03125, %v1521_v30 }
0x11be   :  { %v1525_v20 = vsub.f32 %v1515_v26, %v1523_v19  ;;  %v1526_v32 = vmul.f32 %v1524_v31, %v1524_v31 }
0x11c0   :  { %v1528_v33 = vsel %vm130_vm3, %v1526_v32, 0.0  ;;  %v1527_v34 = vmul.f32 %v1525_v20, %v1525_v20 }
0x11c1   :  { %1529 = vadd.xlane.f32.xlu0 %v1528_v33 }
0x11c2   :  { %v1531_v60 = vsel %vm130_vm3, %v1527_v34, 0.0 }
0x11c5   :  { %1532 = vadd.xlane.f32.xlu0 %v1531_v60 }
0x124e   :  { %v1530_v38 = vpop.xlane.xlu0 %1529 }
0x124f   :  { %v1534_v39 = vmul.f32 0.03125, %v1530_v38 }
0x1251   :  { %v1536_v42 = vadd.f32 1e-05, %v1534_v39  ;;  %v1727_v39 = vrot.slane %v2476_v63, %v909_v50 }
0x1252   :  { %v1533_v43 = vpop.xlane.xlu0 %1532 }
0x1253   :  { %2176 = vrsqrt.f32 %v1536_v42  ;;  %v1535_v21 = vmul.f32 0.03125, %v1533_v43 }
0x1255   :  { %v1537_v40 = vadd.f32 1e-05, %v1535_v21 }
0x1257   :  { %2178 = vrsqrt.f32 %v1537_v40 }
0x125d   :  { %v2177_v22 = vpop.eup %2176 }
0x125e   :  { %v1540_v44 = vmul.f32 %v2177_v22, %v1524_v31 }
0x1260   :  { %v1546_v46 = vmul.f32 %v1545_v41, %v1540_v44 }
0x1261   :  { %v2179_v45 = vpop.eup %2178 }
0x1262   :  { %v1541_v47 = vmul.f32 %v2179_v45, %v1525_v20  ;;  %v1552_v53 = vadd.f32 %v1551_v49, %v1546_v46 }
0x1264   :  { %v1547_v52 = vmul.f32 %v1545_v41, %v1541_v47 }
0x1266   :  { %v1553_v54 = vadd.f32 %v1551_v49, %v1547_v52 }
0x1268   :  { %v1554_v56 = vpack.c.bf16 %v1553_v54, %v1552_v53 }
0x126a   :  { %2072 = vmatmul.mubr.msk.bf16.vlgmr.msra.gmra.mrb[48].mxu0 %vm130_vm3, %v1554_v56 }
0x133d   :  { %v1608_v62 = vpop.f32.mrb[48].mxu0 }
0x133e   :  { %v1609_v24 = vadd.f32 %v1608_v62, %v1558_v59  ;;  %v2073_v1 = vpop.f32.mrb[49].mxu0 }
0x133f   :  { %v1611_v55 = vpop.f32.mrb[50].mxu0  ;;  %v2188_v1 = vld [vmem:[%s2620_s2] sm:$0xff]  ;;  %s2245_s2 = smov [#allocation5]  }
0x1340   :  { %v1612_v2 = vadd.f32 %v1611_v55, %v1558_v59  ;;  %v2074_v4 = vpop.f32.mrb[51].mxu0  ;;  %v1615_v5 = vmax.f32 %v1609_v24, 0.0  ;;  %v1759_v55 = vrot.slane %v2188_v1, %v2411_v18  ;;  %s1797_s16 = sshll.u32 %s2245_s2, 4  ;;  %s1798_s16 = int_to_ptr.vmem [resolvable:$true] %s1797_s16 }
0x1341   :  { %v1765_v4 = vrot.slane %v2188_v1, %v2426_v51  ;;  %s2211_s17 = scalar_lea.vmem %s1798_s16, 32  ;;  %p2216_p9 = scmp.lt.s32.totalorder %s1798_s16, %s1798_s16 }
0x1342   :  { %v1616_v6 = vmax.f32 %v1612_v2, 0.0  ;;  %p2212_p8 = scmp.ne.s32.totalorder %s1798_s16, %s2211_s17  ;;  %p2217_p10 = scmp.lt.s32.totalorder %s2211_s17, %s2211_s17 }
0x1344   :  { %v1617_v7 = vpack.c.bf16 %v1616_v6, %v1615_v5  ;;  %p2218_p11 = por %p2217_p10, %p2216_p9 }
0x1346   :  { %2084 = vmatmul.mubr.msk.bf16.vlgmr.msra.gmra.mrb[44].mxu1 %vm828_vm5, %v1617_v7  ;;  %p2219_p12 = pnand %p2218_p11, %p2212_p8 }
0x1419   :  { %v1683_v8 = vpop.f32.mrb[44].mxu1 }
0x141a   :  { %v1684_v11 = vadd.f32 %v1683_v8, %v1621_v0  ;;  %v2085_v12 = vpop.f32.mrb[45].mxu1 }
0x141b   :  { %v1686_v13 = vpop.f32.mrb[46].mxu1 }
0x141c   :  { %v1687_v3 = vadd.f32 %v1686_v13, %v1621_v0  ;;  %v2086_v10 = vpop.f32.mrb[47].mxu1  ;;  %v1690_v14 = vadd.f32 %v1684_v11, %v1552_v53 }
0x141e   :  { %v1692_v15 = vsel %vm130_vm3, %v1690_v14, 0.0  ;;  %v1691_v17 = vadd.f32 %v1687_v3, %v1553_v54 }
0x141f   :  { %1693 = vadd.xlane.f32.xlu1 %v1692_v15 }
0x1420   :  { %v1695_v23 = vsel %vm130_vm3, %v1691_v17, 0.0 }
0x1421   :  { %1696 = vadd.xlane.f32.xlu0 %v1695_v23 }
0x14ac   :  { %v1694_v25 = vpop.xlane.xlu1 %1693 }
0x14ad   :  { %v1698_v26 = vmul.f32 0.03125, %v1694_v25 }
0x14ae   :  { %v1697_v27 = vpop.xlane.xlu0 %1696 }
0x14af   :  { %v1700_v28 = vsub.f32 %v1690_v14, %v1698_v26  ;;  %v1699_v29 = vmul.f32 0.03125, %v1697_v27 }
0x14b1   :  { %v1701_v16 = vsub.f32 %v1691_v17, %v1699_v29  ;;  %v1702_v30 = vmul.f32 %v1700_v28, %v1700_v28 }
0x14b3   :  { %v1704_v31 = vsel %vm130_vm3, %v1702_v30, 0.0  ;;  %v1703_v19 = vmul.f32 %v1701_v16, %v1701_v16 }
0x14b4   :  { %1705 = vadd.xlane.f32.xlu1 %v1704_v31 }
0x14b5   :  { %v1707_v20 = vsel %vm130_vm3, %v1703_v19, 0.0 }
0x14b6   :  { %1708 = vadd.xlane.f32.xlu0 %v1707_v20 }
0x1541   :  { %v1706_v32 = vpop.xlane.xlu1 %1705 }
0x1542   :  { %v1710_v33 = vmul.f32 0.03125, %v1706_v32 }
0x1543   :  { %v1709_v34 = vpop.xlane.xlu0 %1708 }
0x1544   :  { %v1712_v60 = vadd.f32 1e-05, %v1710_v33  ;;  %v1711_v35 = vmul.f32 0.03125, %v1709_v34 }
0x1546   :  { %2180 = vrsqrt.f32 %v1712_v60  ;;  %v1713_v61 = vadd.f32 1e-05, %v1711_v35 }
0x1548   :  { %2182 = vrsqrt.f32 %v1713_v61 }
0x1550   :  { %v2181_v37 = vpop.eup %2180 }
0x1551   :  { %v1716_v38 = vmul.f32 %v2181_v37, %v1700_v28 }
0x1552   :  { %v2183_v42 = vpop.eup %2182 }
0x1553   :  { %v1722_v43 = vmul.f32 %v1721_v36, %v1716_v38  ;;  %v1717_v21 = vmul.f32 %v2183_v42, %v1701_v16 }
0x1555   :  { %v1728_v40 = vadd.f32 %v1727_v39, %v1722_v43  ;;  %v1723_v22 = vmul.f32 %v1721_v36, %v1717_v21 }
0x1557   :  { %v1730_v41 = vsel %vm130_vm3, %v1728_v40, 0.0  ;;  %v1729_v44 = vadd.f32 %v1727_v39, %v1723_v22 }
0x1558   :  { %1731 = vadd.xlane.f32.xlu1 %v1730_v41 }
0x1559   :  { %v1733_v45 = vsel %vm130_vm3, %v1729_v44, 0.0 }
0x155a   :  { %1734 = vadd.xlane.f32.xlu0 %v1733_v45 }
0x15e5   :  { %v1732_v46 = vpop.xlane.xlu1 %1731 }
0x15e6   :  { %v1736_v48 = vmul.f32 0.03125, %v1732_v46 }
0x15e7   :  { %v1735_v47 = vpop.xlane.xlu0 %1734 }
0x15e8   :  { %v1738_v49 = vsub.f32 %v1728_v40, %v1736_v48  ;;  %v1737_v52 = vmul.f32 0.03125, %v1735_v47 }
0x15ea   :  { %v1739_v9 = vsub.f32 %v1729_v44, %v1737_v52  ;;  %v1740_v53 = vmul.f32 %v1738_v49, %v1738_v49 }
0x15ec   :  { %v1742_v50 = vsel %vm130_vm3, %v1740_v53, 0.0  ;;  %v1741_v63 = vmul.f32 %v1739_v9, %v1739_v9 }
0x15ed   :  { %1743 = vadd.xlane.f32.xlu1 %v1742_v50 }
0x15ee   :  { %v1745_v54 = vsel %vm130_vm3, %v1741_v63, 0.0 }
0x15ef   :  { %1746 = vadd.xlane.f32.xlu0 %v1745_v54 }
0x167a   :  { %v1744_v56 = vpop.xlane.xlu1 %1743 }
0x167b   :  { %v1748_v57 = vmul.f32 0.03125, %v1744_v56 }
0x167c   :  { %v1747_v58 = vpop.xlane.xlu0 %1746 }
0x167d   :  { %v1750_v59 = vadd.f32 1e-05, %v1748_v57  ;;  %v1749_v62 = vmul.f32 0.03125, %v1747_v58 }
0x167f   :  { %2184 = vrsqrt.f32 %v1750_v59  ;;  %v1751_v24 = vadd.f32 1e-05, %v1749_v62 }
0x1681   :  { %2186 = vrsqrt.f32 %v1751_v24 }
0x1689   :  { %v2185_v2 = vpop.eup %2184 }
0x168a   :  { %v1754_v5 = vmul.f32 %v2185_v2, %v1738_v49 }
0x168b   :  { %v2187_v6 = vpop.eup %2186 }
0x168c   :  { %v1760_v7 = vmul.f32 %v1759_v55, %v1754_v5  ;;  %v1755_v0 = vmul.f32 %v2187_v6, %v1739_v9 }
0x168e   :  { %v1766_v8 = vadd.f32 %v1765_v4, %v1760_v7  ;;  %v1761_v11 = vmul.f32 %v1759_v55, %v1755_v0 }
0x1690   :  { %v1767_v12 = vadd.f32 %v1765_v4, %v1761_v11  ;;  %v1768_v13 = vsel %vm130_vm3, %v1766_v8, -inf }
0x1691   :  { %v1769_v3 = vrot.slane %v1768_v13, 4 }
0x1692   :  { %v1775_v10 = vsel %vm130_vm3, %v1767_v12, -inf }
0x1693   :  { %v1770_v14 = vmax.f32 %v1768_v13, %v1769_v3  ;;  %v1776_v15 = vrot.slane %v1775_v10, 4 }
0x1695   :  { %v1771_v17 = vrot.slane %v1770_v14, 2  ;;  %v1777_v23 = vmax.f32 %v1775_v10, %v1776_v15 }
0x1697   :  { %v1772_v18 = vmax.f32 %v1770_v14, %v1771_v17  ;;  %v1778_v25 = vrot.slane %v1777_v23, 2 }
0x1699   :  { %v1773_v26 = vrot.slane %v1772_v18, 1  ;;  %v1779_v51 = vmax.f32 %v1777_v23, %v1778_v25 }
0x169b   :  { %v1774_v27 = vmax.f32 %v1772_v18, %v1773_v26  ;;  %v1780_v28 = vrot.slane %v1779_v51, 1 }
0x169d   :  { %v1781_v29 = vmax.f32 %v1779_v51, %v1780_v28  ;;  %v1782_v16 = vmax.f32 %v1774_v27, 0.0 }
0x169f   :  { %v1783_v30 = vmax.f32 %v1781_v29, 0.0 }
0x16a1   :  { %v1787_v31 = vsel %vm1786_vm6, %v1783_v30, %v1782_v16 }
0x16a2   :  { %1790 = vst.msk [vmem:[#allocation5] sm:$0x3] %vm1789_vm7, %v1787_v31 }
0x16a3   :  { %2222 = shalt.err (!%p2219_p12)
}
0x16a4   :  { %s2223_s20 = scalar_lea.hbm %s2621_s3, 32 }
0x16a5   :  { %p2224_p13 = scmp.ne.s32.totalorder %s2621_s3, %s2223_s20  ;;  %p2227_p0 = scmp.lt.u32.totalorder %s2223_s20, %s2621_s3 }
0x16a7   :  { %p2229_p1 = pnand %p2227_p0, %p2224_p13 }
0x16a9   :  { %2232 = shalt.err (!%p2229_p1)
}
0x16aa   :  { %1800 = dma.vmem_to_hbm [thread:$0]  %s1798_s16, 32, %s2621_s3, [#allocation4]  }
0x16ab   :  { %2235 = dma.done.wait [#allocation4], 32  }
0x16ac   :  { %2236 = vsyncadd [#allocation4], 4294967264 }
0x16ad   :  { %1804 = vsyncpa [#allocation3], 1 }
0x16ae   :  { %1805 = vsyncpa [#allocation4], 1 }

</bundles_post_ra>
